<compile_context>
chip_gen: v7x
topology: tpu7x:2x2x1
jax: 0.10.0
libtpu: 0.0.40
codegen_flags: <defaults>
</compile_context>

<pallas_src>
import functools

import jax
import jax.numpy as jnp
from jax.experimental import pallas as pl
from jax.experimental.pallas import tpu as pltpu  # noqa: F401  (TPU backend import)

# ---- hyperparameters (consistent with the module's structure, kept small) ----
DIM = 32                    # query_dim / LayerNorm dim
N_HEADS = 4                 # heads
D_HEAD = 8                  # dim_head
INNER = N_HEADS * D_HEAD    # 32  (attention inner dim)
FF_INNER = DIM * 4          # 128 (FeedForward inner dim, mult=4, gated)
EPS = 1e-5                  # nn.LayerNorm default eps


# ----------------------------- kernel helpers -----------------------------

def _layer_norm(x, g, b):
    mu = jnp.mean(x, axis=-1, keepdims=True)
    var = jnp.mean((x - mu) ** 2, axis=-1, keepdims=True)
    return (x - mu) * jax.lax.rsqrt(var + EPS) * g + b


def _gelu_exact(x):
    # exact (erf-based) GELU, matching torch.nn.functional.gelu default
    return 0.5 * x * (1.0 + jax.lax.erf(x * jnp.float32(0.7071067811865476)))


def _mha(q, k, v, *, B, Nq, Nk, heads, dim_head):
    """Head-batched attention.  q: (B*Nq, H*d), k/v: (B*Nk, H*d) -> (B*Nq, H*d)."""
    f32 = jnp.float32
    # fold the 1/sqrt(d) scale into q (cheaper than scaling the (Nq, Nk) scores)
    q = q * jnp.float32(float(dim_head) ** -0.5)

    def to_heads(t, n):
        return (t.reshape(B, n, heads, dim_head)
                 .transpose(0, 2, 1, 3)
                 .reshape(B * heads, n, dim_head))

    qh, kh, vh = to_heads(q, Nq), to_heads(k, Nk), to_heads(v, Nk)
    s = jnp.einsum('zqd,zkd->zqk', qh, kh, preferred_element_type=f32)
    s = s - jnp.max(s, axis=-1, keepdims=True)
    p = jnp.exp(s)
    # approximate EUP reciprocal: rows sum to ~1 (documented divergence from exact softmax)
    p = p * pl.reciprocal(jnp.sum(p, axis=-1, keepdims=True), approx=True)
    o = jnp.einsum('zqk,zkd->zqd', p, vh, preferred_element_type=f32)
    return (o.reshape(B, heads, Nq, dim_head)
             .transpose(0, 2, 1, 3)
             .reshape(B * Nq, heads * dim_head))


# ----------------------------- fused Pallas kernel -----------------------------

def _fused_block_kernel(*refs, heads, dim_head, B, N, Nk, D, Dc, ff_inner,
                        offs, has_context):
    if has_context:
        x_ref, ctx_ref, wp_ref, w2_ref, vec_ref, b1_ref, o_ref = refs
    else:
        x_ref, wp_ref, w2_ref, vec_ref, b1_ref, o_ref = refs
        ctx_ref = None

    f32 = jnp.float32
    inner = heads * dim_head
    o_qkv1, o_q2, o_kv2, o_o1, o_o2, o_w1 = offs

    x = x_ref[...].astype(f32)                     # (B*N, D) row slab
    vec = vec_ref[...].astype(f32)                 # (9, D): LN params + small biases

    # ---------- attn1: pre-LN, fused QKV projection, self-attention ----------
    h1 = _layer_norm(x, vec[0:1], vec[1:2])
    qkv = jnp.dot(h1, wp_ref[0:D, o_qkv1:o_qkv1 + 3 * inner].astype(f32),
                  preferred_element_type=f32)      # (B*N, 3*inner)
    a1 = _mha(qkv[:, :inner], qkv[:, inner:2 * inner], qkv[:, 2 * inner:],
              B=B, Nq=N, Nk=N, heads=heads, dim_head=dim_head)
    a1 = jnp.dot(a1, wp_ref[0:inner, o_o1:o_o1 + D].astype(f32),
                 preferred_element_type=f32) + vec[6:7]
    x = x + a1

    # ---------- attn2: pre-LN, cross-attention (self if no context) ----------
    h2 = _layer_norm(x, vec[2:3], vec[3:4])
    q2 = jnp.dot(h2, wp_ref[0:D, o_q2:o_q2 + inner].astype(f32),
                 preferred_element_type=f32)
    ctx = ctx_ref[...].astype(f32) if has_context else h2           # (B*Nk, Dc)
    kv2 = jnp.dot(ctx, wp_ref[0:Dc, o_kv2:o_kv2 + 2 * inner].astype(f32),
                  preferred_element_type=f32)      # (B*Nk, 2*inner)
    a2 = _mha(q2, kv2[:, :inner], kv2[:, inner:],
              B=B, Nq=N, Nk=Nk, heads=heads, dim_head=dim_head)
    a2 = jnp.dot(a2, wp_ref[0:inner, o_o2:o_o2 + D].astype(f32),
                 preferred_element_type=f32) + vec[7:8]
    x = x + a2

    # ---------- FeedForward (GEGLU), pre-LN ----------
    h3 = _layer_norm(x, vec[4:5], vec[5:6])
    hf = jnp.dot(h3, wp_ref[0:D, o_w1:o_w1 + 2 * ff_inner].astype(f32),
                 preferred_element_type=f32) + b1_ref[...].astype(f32)
    hf = hf[:, :ff_inner] * _gelu_exact(hf[:, ff_inner:])
    ff = jnp.dot(hf, w2_ref[...].astype(f32),
                 preferred_element_type=f32) + vec[8:9]
    x = x + ff

    o_ref[...] = x.astype(o_ref.dtype)


# ----------------------------- wrapper -----------------------------

def _pack_params(params, D, Dc, inner):
    """Pack weight matrices into one lane-aligned buffer + LN/bias vectors into one."""
    rmax = max(D, Dc, inner)

    def seg(w, rows):
        cols = w.shape[1]
        aligned = ((cols + 127) // 128) * 128      # 128-lane aligned segment
        return jnp.pad(w, ((0, rmax - rows), (0, aligned - cols))), aligned

    pieces, offs, off = [], [], 0
    for w, rows in [
        (params["attn1"]["wqkv"], D),        # (D, 3*inner)
        (params["attn2"]["wq"], D),          # (D, inner)
        (params["attn2"]["wkv"], Dc),        # (Dc, 2*inner)
        (params["attn1"]["wo"], inner),      # (inner, D)
        (params["attn2"]["wo"], inner),      # (inner, D)
        (params["ff"]["w1"], D),             # (D, 2*ff_inner)
    ]:
        p, aligned = seg(w, rows)
        pieces.append(p)
        offs.append(off)
        off += aligned
    wpack = jnp.concatenate(pieces, axis=1)        # (rmax, 896) for default sizes

    vecs = jnp.concatenate([
        params["n1_g"], params["n1_b"],
        params["n2_g"], params["n2_b"],
        params["n3_g"], params["n3_b"],
        params["attn1"]["bo"], params["attn2"]["bo"], params["ff"]["b2"],
    ], axis=0)                                     # (9, D)
    return wpack, vecs, tuple(offs)


def basic_transformer_block(x, context, params, *, heads=N_HEADS, dim_head=D_HEAD):
    B, N, D = x.shape
    has_context = context is not None
    if has_context:
        _, Nk, Dc = context.shape
    else:
        Nk, Dc = N, D
    inner = heads * dim_head
    ff_inner = params["ff"]["w2"].shape[0]

    wpack, vecs, offs = _pack_params(params, D, Dc, inner)

    kernel = functools.partial(
        _fused_block_kernel, heads=heads, dim_head=dim_head,
        B=B, N=N, Nk=Nk, D=D, Dc=Dc, ff_inner=ff_inner,
        offs=offs, has_context=has_context)

    args = [x.reshape(B * N, D)]
    if has_context:
        args.append(context.reshape(B * Nk, Dc))
    args += [wpack, params["ff"]["w2"], vecs, params["ff"]["b1"]]

    # No grid: single fused invocation, whole arrays resident in VMEM (everything is tiny).
    out = pl.pallas_call(
        kernel,
        out_shape=jax.ShapeDtypeStruct((B * N, D), x.dtype),
    )(*args)
    return out.reshape(B, N, D)


# ----------------------------- pure-JAX reference (for verification) -----------------------------

def _reference_block(x, context, params):
    def ln(v, g, b):
        mu = v.mean(-1, keepdims=True)
        var = ((v - mu) ** 2).mean(-1, keepdims=True)
        return (v - mu) / jnp.sqrt(var + EPS) * g + b

    def attn(q_in, kv_in, wq, wkv, wo, bo):
        B, Nq, _ = q_in.shape
        Nk = kv_in.shape[1]
        q = q_in @ wq
        kv = kv_in @ wkv
        k, v = kv[..., :INNER], kv[..., INNER:]

        def split(t, n):
            return t.reshape(B, n, N_HEADS, D_HEAD).transpose(0, 2, 1, 3)

        qh, kh, vh = split(q, Nq), split(k, Nk), split(v, Nk)
        s = jnp.einsum("bhqd,bhkd->bhqk", qh, kh) * (float(D_HEAD) ** -0.5)
        p = jax.nn.softmax(s, axis=-1)
        o = jnp.einsum("bhqk,bhkd->bhqd", p, vh)
        o = o.transpose(0, 2, 1, 3).reshape(B, Nq, INNER)
        return o @ wo + bo

    h = ln(x, params["n1_g"], params["n1_b"])
    w1 = params["attn1"]["wqkv"]
    x = x + attn(h, h, w1[:, :INNER], w1[:, INNER:],
                 params["attn1"]["wo"], params["attn1"]["bo"])

    h = ln(x, params["n2_g"], params["n2_b"])
    ctx = h if context is None else context
    x = x + attn(h, ctx, params["attn2"]["wq"], params["attn2"]["wkv"],
                 params["attn2"]["wo"], params["attn2"]["bo"])

    h = ln(x, params["n3_g"], params["n3_b"])
    hf = h @ params["ff"]["w1"] + params["ff"]["b1"]
    val, gate = hf[..., :FF_INNER], hf[..., FF_INNER:]
    hf = val * (0.5 * gate * (1.0 + jax.lax.erf(gate / jnp.sqrt(2.0))))
    return x + hf @ params["ff"]["w2"] + params["ff"]["b2"]


# ----------------------------- parameter init -----------------------------

def init_params(key):
    ks = jax.random.split(key, 8)
    s = 0.02

    def w(k, shape):
        return (s * jax.random.normal(k, shape)).astype(jnp.float32)

    attn1 = dict(
        wqkv=w(ks[0], (DIM, 3 * INNER)),                 # fused Q|K|V (no bias)
        wo=w(ks[1], (INNER, DIM)), bo=jnp.zeros((1, DIM), jnp.float32),
    )
    attn2 = dict(
        wq=w(ks[2], (DIM, INNER)),
        wkv=w(ks[3], (DIM, 2 * INNER)),                  # fused K|V (no bias)
        wo=w(ks[4], (INNER, DIM)), bo=jnp.zeros((1, DIM), jnp.float32),
    )
    ff = dict(
        w1=w(ks[5], (DIM, 2 * FF_INNER)), b1=jnp.zeros((1, 2 * FF_INNER), jnp.float32),
        w2=w(ks[6], (FF_INNER, DIM)), b2=jnp.zeros((1, DIM), jnp.float32),
    )
    return dict(
        attn1=attn1, attn2=attn2, ff=ff,
        n1_g=jnp.ones((1, DIM), jnp.float32), n1_b=jnp.zeros((1, DIM), jnp.float32),
        n2_g=jnp.ones((1, DIM), jnp.float32), n2_b=jnp.zeros((1, DIM), jnp.float32),
        n3_g=jnp.ones((1, DIM), jnp.float32), n3_b=jnp.zeros((1, DIM), jnp.float32),
    )


# ----------------------------- main -----------------------------

if __name__ == "__main__":
    key = jax.random.PRNGKey(0)
    k_x, k_c, k_p = jax.random.split(key, 3)

    B, N = 2, 8
    x = jax.random.normal(k_x, (B, N, DIM), dtype=jnp.float32)
    ctx = jax.random.normal(k_c, (B, N, DIM), dtype=jnp.float32)
    params = init_params(k_p)

    # self-attention path (context=None -> attn2 attends to norm2(x))
    fwd_self = jax.jit(lambda xx: basic_transformer_block(xx, None, params))
    out_self = jax.block_until_ready(fwd_self(x))
    assert out_self.shape == (B, N, DIM)
    ref_self = _reference_block(x, None, params)
    assert jnp.allclose(out_self, ref_self, atol=5e-3, rtol=5e-3), "self-attn path mismatch"

    # cross-attention path (explicit context)
    fwd_cross = jax.jit(lambda xx, cc: basic_transformer_block(xx, cc, params))
    out_cross = jax.block_until_ready(fwd_cross(x, ctx))
    assert out_cross.shape == (B, N, DIM)
    ref_cross = _reference_block(x, ctx, params)
    assert jnp.allclose(out_cross, ref_cross, atol=5e-3, rtol=5e-3), "cross-attn path mismatch"

    print("KERNEL_OK")
</pallas_src>

<mosaic_0001>
module attributes {stable_mosaic.version = 11 : i64} {
  func.func @_fused_block_kernel(%arg0: memref<16x32xf32, #tpu.memory_space<vmem>>, %arg1: memref<32x896xf32, #tpu.memory_space<vmem>>, %arg2: memref<128x32xf32, #tpu.memory_space<vmem>>, %arg3: memref<9x32xf32, #tpu.memory_space<vmem>>, %arg4: memref<1x256xf32, #tpu.memory_space<vmem>>, %arg5: memref<16x32xf32, #tpu.memory_space<vmem>>) attributes {dimension_semantics = [], scalar_prefetch = 0 : i64, scratch_operands = 0 : i64, tpu.core_type = #tpu.core_type<tc>} {
    %c0 = arith.constant 0 : index
    %c0_0 = arith.constant 0 : index
    %0 = vector.load %arg0[%c0, %c0_0] : memref<16x32xf32, #tpu.memory_space<vmem>>, vector<16x32xf32>
    %c0_1 = arith.constant 0 : index
    %c0_2 = arith.constant 0 : index
    %1 = vector.load %arg3[%c0_1, %c0_2] : memref<9x32xf32, #tpu.memory_space<vmem>>, vector<9x32xf32>
    %2 = vector.extract_strided_slice %1 {offsets = [0, 0], sizes = [1, 32], strides = [1, 1]} : vector<9x32xf32> to vector<1x32xf32>
    %3 = vector.extract_strided_slice %1 {offsets = [1, 0], sizes = [1, 32], strides = [1, 1]} : vector<9x32xf32> to vector<1x32xf32>
    %cst = arith.constant dense<0.000000e+00> : vector<16xf32>
    %4 = vector.multi_reduction <add>, %0, %cst [1] : vector<16x32xf32> to vector<16xf32>
    %5 = vector.shape_cast %4 : vector<16xf32> to vector<16x1xf32>
    %cst_3 = arith.constant 3.200000e+01 : f32
    %6 = vector.broadcast %cst_3 : f32 to vector<16x1xf32>
    %7 = arith.divf %5, %6 : vector<16x1xf32>
    %8 = vector.broadcast %7 : vector<16x1xf32> to vector<16x32xf32>
    %9 = arith.subf %0, %8 : vector<16x32xf32>
    %10 = arith.mulf %9, %9 : vector<16x32xf32>
    %cst_4 = arith.constant dense<0.000000e+00> : vector<16xf32>
    %11 = vector.multi_reduction <add>, %10, %cst_4 [1] : vector<16x32xf32> to vector<16xf32>
    %12 = vector.shape_cast %11 : vector<16xf32> to vector<16x1xf32>
    %cst_5 = arith.constant 3.200000e+01 : f32
    %13 = vector.broadcast %cst_5 : f32 to vector<16x1xf32>
    %14 = arith.divf %12, %13 : vector<16x1xf32>
    %15 = vector.broadcast %7 : vector<16x1xf32> to vector<16x32xf32>
    %16 = arith.subf %0, %15 : vector<16x32xf32>
    %cst_6 = arith.constant 9.99999974E-6 : f32
    %17 = vector.broadcast %cst_6 : f32 to vector<16x1xf32>
    %18 = arith.addf %14, %17 : vector<16x1xf32>
    %19 = math.rsqrt %18 : vector<16x1xf32>
    %20 = vector.broadcast %19 : vector<16x1xf32> to vector<16x32xf32>
    %21 = arith.mulf %16, %20 : vector<16x32xf32>
    %22 = vector.broadcast %2 : vector<1x32xf32> to vector<16x32xf32>
    %23 = arith.mulf %21, %22 : vector<16x32xf32>
    %24 = vector.broadcast %3 : vector<1x32xf32> to vector<16x32xf32>
    %25 = arith.addf %23, %24 : vector<16x32xf32>
    %c0_7 = arith.constant 0 : index
    %c0_8 = arith.constant 0 : index
    %26 = vector.load %arg1[%c0_7, %c0_8] : memref<32x896xf32, #tpu.memory_space<vmem>>, vector<32x96xf32>
    %cst_9 = arith.constant dense<0.000000e+00> : vector<16x96xf32>
    %27 = tpu.matmul %25, %26, %cst_9 {dimension_numbers = #tpu.dot_dimension_numbers<[1], [0], [0], [1], [0, 0, 1, 1], [], []>} : vector<16x32xf32>, vector<32x96xf32>, vector<16x96xf32> -> vector<16x96xf32>
    %28 = vector.extract_strided_slice %27 {offsets = [0, 0], sizes = [16, 32], strides = [1, 1]} : vector<16x96xf32> to vector<16x32xf32>
    %29 = vector.extract_strided_slice %27 {offsets = [0, 32], sizes = [16, 32], strides = [1, 1]} : vector<16x96xf32> to vector<16x32xf32>
    %30 = vector.extract_strided_slice %27 {offsets = [0, 64], sizes = [16, 32], strides = [1, 1]} : vector<16x96xf32> to vector<16x32xf32>
    %cst_10 = arith.constant 0.353553385 : f32
    %31 = vector.broadcast %cst_10 : f32 to vector<16x32xf32>
    %32 = arith.mulf %28, %31 : vector<16x32xf32>
    %33 = vector.shape_cast %32 : vector<16x32xf32> to vector<2x8x4x8xf32>
    %34 = tpu.transpose %33, [0, 2, 1, 3] : vector<2x8x4x8xf32> -> vector<2x4x8x8xf32>
    %35 = vector.shape_cast %34 : vector<2x4x8x8xf32> to vector<8x8x8xf32>
    %36 = vector.shape_cast %29 : vector<16x32xf32> to vector<2x8x4x8xf32>
    %37 = tpu.transpose %36, [0, 2, 1, 3] : vector<2x8x4x8xf32> -> vector<2x4x8x8xf32>
    %38 = vector.shape_cast %37 : vector<2x4x8x8xf32> to vector<8x8x8xf32>
    %39 = vector.shape_cast %30 : vector<16x32xf32> to vector<2x8x4x8xf32>
    %40 = tpu.transpose %39, [0, 2, 1, 3] : vector<2x8x4x8xf32> -> vector<2x4x8x8xf32>
    %41 = vector.shape_cast %40 : vector<2x4x8x8xf32> to vector<8x8x8xf32>
    "tpu.trace_start"() <{level = 10 : i32, message = "zqd,zkd->zqk"}> : () -> ()
    %cst_11 = arith.constant dense<0.000000e+00> : vector<8x8x8xf32>
    %42 = tpu.matmul %35, %38, %cst_11 {dimension_numbers = #tpu.dot_dimension_numbers<[2], [2], [1], [1], [0, 0, 0, 1, 1, 1], [0], [0]>} : vector<8x8x8xf32>, vector<8x8x8xf32>, vector<8x8x8xf32> -> vector<8x8x8xf32>
    "tpu.trace_stop"() : () -> ()
    %cst_12 = arith.constant dense<0xFF800000> : vector<8x8xf32>
    %43 = vector.multi_reduction <maximumf>, %42, %cst_12 [2] : vector<8x8x8xf32> to vector<8x8xf32>
    %44 = vector.shape_cast %43 : vector<8x8xf32> to vector<8x8x1xf32>
    %45 = vector.broadcast %44 : vector<8x8x1xf32> to vector<8x8x8xf32>
    %46 = arith.subf %42, %45 : vector<8x8x8xf32>
    %47 = math.exp %46 : vector<8x8x8xf32>
    %cst_13 = arith.constant dense<0.000000e+00> : vector<8x8xf32>
    %48 = vector.multi_reduction <add>, %47, %cst_13 [2] : vector<8x8x8xf32> to vector<8x8xf32>
    %49 = vector.shape_cast %48 : vector<8x8xf32> to vector<8x8x1xf32>
    %50 = tpu.reciprocal %49 {approx = true} : vector<8x8x1xf32> -> vector<8x8x1xf32>
    %51 = vector.broadcast %50 : vector<8x8x1xf32> to vector<8x8x8xf32>
    %52 = arith.mulf %47, %51 : vector<8x8x8xf32>
    "tpu.trace_start"() <{level = 10 : i32, message = "zqk,zkd->zqd"}> : () -> ()
    %cst_14 = arith.constant dense<0.000000e+00> : vector<8x8x8xf32>
    %53 = tpu.matmul %52, %41, %cst_14 {dimension_numbers = #tpu.dot_dimension_numbers<[2], [1], [1], [2], [0, 0, 0, 1, 1, 2], [0], [0]>} : vector<8x8x8xf32>, vector<8x8x8xf32>, vector<8x8x8xf32> -> vector<8x8x8xf32>
    "tpu.trace_stop"() : () -> ()
    %54 = vector.shape_cast %53 : vector<8x8x8xf32> to vector<2x4x8x8xf32>
    %55 = tpu.transpose %54, [0, 2, 1, 3] : vector<2x4x8x8xf32> -> vector<2x8x4x8xf32>
    %56 = vector.shape_cast %55 : vector<2x8x4x8xf32> to vector<16x32xf32>
    %c0_15 = arith.constant 0 : index
    %c384 = arith.constant 384 : index
    %57 = vector.load %arg1[%c0_15, %c384] : memref<32x896xf32, #tpu.memory_space<vmem>>, vector<32x32xf32>
    %cst_16 = arith.constant dense<0.000000e+00> : vector<16x32xf32>
    %58 = tpu.matmul %56, %57, %cst_16 {dimension_numbers = #tpu.dot_dimension_numbers<[1], [0], [0], [1], [0, 0, 1, 1], [], []>} : vector<16x32xf32>, vector<32x32xf32>, vector<16x32xf32> -> vector<16x32xf32>
    %59 = vector.extract_strided_slice %1 {offsets = [6, 0], sizes = [1, 32], strides = [1, 1]} : vector<9x32xf32> to vector<1x32xf32>
    %60 = vector.broadcast %59 : vector<1x32xf32> to vector<16x32xf32>
    %61 = arith.addf %58, %60 : vector<16x32xf32>
    %62 = arith.addf %0, %61 : vector<16x32xf32>
    %63 = vector.extract_strided_slice %1 {offsets = [2, 0], sizes = [1, 32], strides = [1, 1]} : vector<9x32xf32> to vector<1x32xf32>
    %64 = vector.extract_strided_slice %1 {offsets = [3, 0], sizes = [1, 32], strides = [1, 1]} : vector<9x32xf32> to vector<1x32xf32>
    %cst_17 = arith.constant dense<0.000000e+00> : vector<16xf32>
    %65 = vector.multi_reduction <add>, %62, %cst_17 [1] : vector<16x32xf32> to vector<16xf32>
    %66 = vector.shape_cast %65 : vector<16xf32> to vector<16x1xf32>
    %cst_18 = arith.constant 3.200000e+01 : f32
    %67 = vector.broadcast %cst_18 : f32 to vector<16x1xf32>
    %68 = arith.divf %66, %67 : vector<16x1xf32>
    %69 = vector.broadcast %68 : vector<16x1xf32> to vector<16x32xf32>
    %70 = arith.subf %62, %69 : vector<16x32xf32>
    %71 = arith.mulf %70, %70 : vector<16x32xf32>
    %cst_19 = arith.constant dense<0.000000e+00> : vector<16xf32>
    %72 = vector.multi_reduction <add>, %71, %cst_19 [1] : vector<16x32xf32> to vector<16xf32>
    %73 = vector.shape_cast %72 : vector<16xf32> to vector<16x1xf32>
    %cst_20 = arith.constant 3.200000e+01 : f32
    %74 = vector.broadcast %cst_20 : f32 to vector<16x1xf32>
    %75 = arith.divf %73, %74 : vector<16x1xf32>
    %76 = vector.broadcast %68 : vector<16x1xf32> to vector<16x32xf32>
    %77 = arith.subf %62, %76 : vector<16x32xf32>
    %cst_21 = arith.constant 9.99999974E-6 : f32
    %78 = vector.broadcast %cst_21 : f32 to vector<16x1xf32>
    %79 = arith.addf %75, %78 : vector<16x1xf32>
    %80 = math.rsqrt %79 : vector<16x1xf32>
    %81 = vector.broadcast %80 : vector<16x1xf32> to vector<16x32xf32>
    %82 = arith.mulf %77, %81 : vector<16x32xf32>
    %83 = vector.broadcast %63 : vector<1x32xf32> to vector<16x32xf32>
    %84 = arith.mulf %82, %83 : vector<16x32xf32>
    %85 = vector.broadcast %64 : vector<1x32xf32> to vector<16x32xf32>
    %86 = arith.addf %84, %85 : vector<16x32xf32>
    %c0_22 = arith.constant 0 : index
    %c128 = arith.constant 128 : index
    %87 = vector.load %arg1[%c0_22, %c128] : memref<32x896xf32, #tpu.memory_space<vmem>>, vector<32x32xf32>
    %cst_23 = arith.constant dense<0.000000e+00> : vector<16x32xf32>
    %88 = tpu.matmul %86, %87, %cst_23 {dimension_numbers = #tpu.dot_dimension_numbers<[1], [0], [0], [1], [0, 0, 1, 1], [], []>} : vector<16x32xf32>, vector<32x32xf32>, vector<16x32xf32> -> vector<16x32xf32>
    %c0_24 = arith.constant 0 : index
    %c256 = arith.constant 256 : index
    %89 = vector.load %arg1[%c0_24, %c256] : memref<32x896xf32, #tpu.memory_space<vmem>>, vector<32x64xf32>
    %cst_25 = arith.constant dense<0.000000e+00> : vector<16x64xf32>
    %90 = tpu.matmul %86, %89, %cst_25 {dimension_numbers = #tpu.dot_dimension_numbers<[1], [0], [0], [1], [0, 0, 1, 1], [], []>} : vector<16x32xf32>, vector<32x64xf32>, vector<16x64xf32> -> vector<16x64xf32>
    %91 = vector.extract_strided_slice %90 {offsets = [0, 0], sizes = [16, 32], strides = [1, 1]} : vector<16x64xf32> to vector<16x32xf32>
    %92 = vector.extract_strided_slice %90 {offsets = [0, 32], sizes = [16, 32], strides = [1, 1]} : vector<16x64xf32> to vector<16x32xf32>
    %cst_26 = arith.constant 0.353553385 : f32
    %93 = vector.broadcast %cst_26 : f32 to vector<16x32xf32>
    %94 = arith.mulf %88, %93 : vector<16x32xf32>
    %95 = vector.shape_cast %94 : vector<16x32xf32> to vector<2x8x4x8xf32>
    %96 = tpu.transpose %95, [0, 2, 1, 3] : vector<2x8x4x8xf32> -> vector<2x4x8x8xf32>
    %97 = vector.shape_cast %96 : vector<2x4x8x8xf32> to vector<8x8x8xf32>
    %98 = vector.shape_cast %91 : vector<16x32xf32> to vector<2x8x4x8xf32>
    %99 = tpu.transpose %98, [0, 2, 1, 3] : vector<2x8x4x8xf32> -> vector<2x4x8x8xf32>
    %100 = vector.shape_cast %99 : vector<2x4x8x8xf32> to vector<8x8x8xf32>
    %101 = vector.shape_cast %92 : vector<16x32xf32> to vector<2x8x4x8xf32>
    %102 = tpu.transpose %101, [0, 2, 1, 3] : vector<2x8x4x8xf32> -> vector<2x4x8x8xf32>
    %103 = vector.shape_cast %102 : vector<2x4x8x8xf32> to vector<8x8x8xf32>
    "tpu.trace_start"() <{level = 10 : i32, message = "zqd,zkd->zqk"}> : () -> ()
    %cst_27 = arith.constant dense<0.000000e+00> : vector<8x8x8xf32>
    %104 = tpu.matmul %97, %100, %cst_27 {dimension_numbers = #tpu.dot_dimension_numbers<[2], [2], [1], [1], [0, 0, 0, 1, 1, 1], [0], [0]>} : vector<8x8x8xf32>, vector<8x8x8xf32>, vector<8x8x8xf32> -> vector<8x8x8xf32>
    "tpu.trace_stop"() : () -> ()
    %cst_28 = arith.constant dense<0xFF800000> : vector<8x8xf32>
    %105 = vector.multi_reduction <maximumf>, %104, %cst_28 [2] : vector<8x8x8xf32> to vector<8x8xf32>
    %106 = vector.shape_cast %105 : vector<8x8xf32> to vector<8x8x1xf32>
    %107 = vector.broadcast %106 : vector<8x8x1xf32> to vector<8x8x8xf32>
    %108 = arith.subf %104, %107 : vector<8x8x8xf32>
    %109 = math.exp %108 : vector<8x8x8xf32>
    %cst_29 = arith.constant dense<0.000000e+00> : vector<8x8xf32>
    %110 = vector.multi_reduction <add>, %109, %cst_29 [2] : vector<8x8x8xf32> to vector<8x8xf32>
    %111 = vector.shape_cast %110 : vector<8x8xf32> to vector<8x8x1xf32>
    %112 = tpu.reciprocal %111 {approx = true} : vector<8x8x1xf32> -> vector<8x8x1xf32>
    %113 = vector.broadcast %112 : vector<8x8x1xf32> to vector<8x8x8xf32>
    %114 = arith.mulf %109, %113 : vector<8x8x8xf32>
    "tpu.trace_start"() <{level = 10 : i32, message = "zqk,zkd->zqd"}> : () -> ()
    %cst_30 = arith.constant dense<0.000000e+00> : vector<8x8x8xf32>
    %115 = tpu.matmul %114, %103, %cst_30 {dimension_numbers = #tpu.dot_dimension_numbers<[2], [1], [1], [2], [0, 0, 0, 1, 1, 2], [0], [0]>} : vector<8x8x8xf32>, vector<8x8x8xf32>, vector<8x8x8xf32> -> vector<8x8x8xf32>
    "tpu.trace_stop"() : () -> ()
    %116 = vector.shape_cast %115 : vector<8x8x8xf32> to vector<2x4x8x8xf32>
    %117 = tpu.transpose %116, [0, 2, 1, 3] : vector<2x4x8x8xf32> -> vector<2x8x4x8xf32>
    %118 = vector.shape_cast %117 : vector<2x8x4x8xf32> to vector<16x32xf32>
    %c0_31 = arith.constant 0 : index
    %c512 = arith.constant 512 : index
    %119 = vector.load %arg1[%c0_31, %c512] : memref<32x896xf32, #tpu.memory_space<vmem>>, vector<32x32xf32>
    %cst_32 = arith.constant dense<0.000000e+00> : vector<16x32xf32>
    %120 = tpu.matmul %118, %119, %cst_32 {dimension_numbers = #tpu.dot_dimension_numbers<[1], [0], [0], [1], [0, 0, 1, 1], [], []>} : vector<16x32xf32>, vector<32x32xf32>, vector<16x32xf32> -> vector<16x32xf32>
    %121 = vector.extract_strided_slice %1 {offsets = [7, 0], sizes = [1, 32], strides = [1, 1]} : vector<9x32xf32> to vector<1x32xf32>
    %122 = vector.broadcast %121 : vector<1x32xf32> to vector<16x32xf32>
    %123 = arith.addf %120, %122 : vector<16x32xf32>
    %124 = arith.addf %62, %123 : vector<16x32xf32>
    %125 = vector.extract_strided_slice %1 {offsets = [4, 0], sizes = [1, 32], strides = [1, 1]} : vector<9x32xf32> to vector<1x32xf32>
    %126 = vector.extract_strided_slice %1 {offsets = [5, 0], sizes = [1, 32], strides = [1, 1]} : vector<9x32xf32> to vector<1x32xf32>
    %cst_33 = arith.constant dense<0.000000e+00> : vector<16xf32>
    %127 = vector.multi_reduction <add>, %124, %cst_33 [1] : vector<16x32xf32> to vector<16xf32>
    %128 = vector.shape_cast %127 : vector<16xf32> to vector<16x1xf32>
    %cst_34 = arith.constant 3.200000e+01 : f32
    %129 = vector.broadcast %cst_34 : f32 to vector<16x1xf32>
    %130 = arith.divf %128, %129 : vector<16x1xf32>
    %131 = vector.broadcast %130 : vector<16x1xf32> to vector<16x32xf32>
    %132 = arith.subf %124, %131 : vector<16x32xf32>
    %133 = arith.mulf %132, %132 : vector<16x32xf32>
    %cst_35 = arith.constant dense<0.000000e+00> : vector<16xf32>
    %134 = vector.multi_reduction <add>, %133, %cst_35 [1] : vector<16x32xf32> to vector<16xf32>
    %135 = vector.shape_cast %134 : vector<16xf32> to vector<16x1xf32>
    %cst_36 = arith.constant 3.200000e+01 : f32
    %136 = vector.broadcast %cst_36 : f32 to vector<16x1xf32>
    %137 = arith.divf %135, %136 : vector<16x1xf32>
    %138 = vector.broadcast %130 : vector<16x1xf32> to vector<16x32xf32>
    %139 = arith.subf %124, %138 : vector<16x32xf32>
    %cst_37 = arith.constant 9.99999974E-6 : f32
    %140 = vector.broadcast %cst_37 : f32 to vector<16x1xf32>
    %141 = arith.addf %137, %140 : vector<16x1xf32>
    %142 = math.rsqrt %141 : vector<16x1xf32>
    %143 = vector.broadcast %142 : vector<16x1xf32> to vector<16x32xf32>
    %144 = arith.mulf %139, %143 : vector<16x32xf32>
    %145 = vector.broadcast %125 : vector<1x32xf32> to vector<16x32xf32>
    %146 = arith.mulf %144, %145 : vector<16x32xf32>
    %147 = vector.broadcast %126 : vector<1x32xf32> to vector<16x32xf32>
    %148 = arith.addf %146, %147 : vector<16x32xf32>
    %c0_38 = arith.constant 0 : index
    %c640 = arith.constant 640 : index
    %149 = vector.load %arg1[%c0_38, %c640] : memref<32x896xf32, #tpu.memory_space<vmem>>, vector<32x256xf32>
    %cst_39 = arith.constant dense<0.000000e+00> : vector<16x256xf32>
    %150 = tpu.matmul %148, %149, %cst_39 {dimension_numbers = #tpu.dot_dimension_numbers<[1], [0], [0], [1], [0, 0, 1, 1], [], []>} : vector<16x32xf32>, vector<32x256xf32>, vector<16x256xf32> -> vector<16x256xf32>
    %c0_40 = arith.constant 0 : index
    %c0_41 = arith.constant 0 : index
    %151 = vector.load %arg4[%c0_40, %c0_41] : memref<1x256xf32, #tpu.memory_space<vmem>>, vector<1x256xf32>
    %152 = vector.broadcast %151 : vector<1x256xf32> to vector<16x256xf32>
    %153 = arith.addf %150, %152 : vector<16x256xf32>
    %154 = vector.extract_strided_slice %153 {offsets = [0, 0], sizes = [16, 128], strides = [1, 1]} : vector<16x256xf32> to vector<16x128xf32>
    %155 = vector.extract_strided_slice %153 {offsets = [0, 128], sizes = [16, 128], strides = [1, 1]} : vector<16x256xf32> to vector<16x128xf32>
    %cst_42 = arith.constant 5.000000e-01 : f32
    %156 = vector.broadcast %cst_42 : f32 to vector<16x128xf32>
    %157 = arith.mulf %156, %155 : vector<16x128xf32>
    %cst_43 = arith.constant 0.707106769 : f32
    %158 = vector.broadcast %cst_43 : f32 to vector<16x128xf32>
    %159 = arith.mulf %155, %158 : vector<16x128xf32>
    %160 = math.erf %159 : vector<16x128xf32>
    %cst_44 = arith.constant 1.000000e+00 : f32
    %161 = vector.broadcast %cst_44 : f32 to vector<16x128xf32>
    %162 = arith.addf %161, %160 : vector<16x128xf32>
    %163 = arith.mulf %157, %162 : vector<16x128xf32>
    %164 = arith.mulf %154, %163 : vector<16x128xf32>
    %c0_45 = arith.constant 0 : index
    %c0_46 = arith.constant 0 : index
    %165 = vector.load %arg2[%c0_45, %c0_46] : memref<128x32xf32, #tpu.memory_space<vmem>>, vector<128x32xf32>
    %cst_47 = arith.constant dense<0.000000e+00> : vector<16x32xf32>
    %166 = tpu.matmul %164, %165, %cst_47 {dimension_numbers = #tpu.dot_dimension_numbers<[1], [0], [0], [1], [0, 0, 1, 1], [], []>} : vector<16x128xf32>, vector<128x32xf32>, vector<16x32xf32> -> vector<16x32xf32>
    %167 = vector.extract_strided_slice %1 {offsets = [8, 0], sizes = [1, 32], strides = [1, 1]} : vector<9x32xf32> to vector<1x32xf32>
    %168 = vector.broadcast %167 : vector<1x32xf32> to vector<16x32xf32>
    %169 = arith.addf %166, %168 : vector<16x32xf32>
    %170 = arith.addf %124, %169 : vector<16x32xf32>
    %c0_48 = arith.constant 0 : index
    %c0_49 = arith.constant 0 : index
    %171 = vector.load %arg5[%c0_48, %c0_49] : memref<16x32xf32, #tpu.memory_space<vmem>>, vector<16x32xf32>
    tpu.vector_store %arg5[%c0_48, %c0_49], %170 {strides = array<i32>} : memref<16x32xf32, #tpu.memory_space<vmem>>, vector<16x32xf32>,
    return
  }
}

</mosaic_0001>

<bundles_post_ra>
// kernel: _lambda_.1
= control target key start
LH: loop header
LB: loop body
LE: loop exit
PB: predicated region body
PF: predicated region fallthrough
CT: control target
= control target key end

     0   :  { %10 = vsyncpa [#allocation3], 0  ;;  %s7524_s0 = inlined_call_operand.hbm [shape: f32[16,32], index: 0, kind: input, shape index: {}]   ;;  %s7525_s1 = inlined_call_operand.hbm [shape: f32[32,896], index: 1, kind: input, shape index: {}]   ;;  %s7526_s2 = inlined_call_operand.hbm [shape: f32[128,32], index: 2, kind: input, shape index: {}]   ;;  %s7527_s3 = inlined_call_operand.hbm [shape: f32[9,32], index: 3, kind: input, shape index: {}]   ;;  %s7528_s4 = inlined_call_operand.vmem [shape: f32[1,256], index: 4, kind: input, shape index: {}]   ;;  %s7529_s5 = inlined_call_operand.hbm [shape: f32[16,32], index: 5, kind: output, shape index: {}]  }
   0x1   :  { %11 = vsyncpa [#allocation6], 0 }
   0x2   :  { %12 = vsyncpa [#allocation9], 0 }
   0x3   :  { %13 = vsyncpa [#allocation4], 0  ;;  %s6566_s18 = smov [#allocation5]   ;;  %s6448_s22 = scalar_lea.hbm %s7525_s1, 3584 }
   0x4   :  { %s31_s19 = sshll.u32 %s6566_s18, 4  ;;  %p6449_p0 = scmp.ne.s32.totalorder %s7525_s1, %s6448_s22  ;;  %s32_s19 = int_to_ptr.vmem [resolvable:$true] %s31_s19 }
   0x5   :  { %p6452_p1 = scmp.lt.u32.totalorder %s6448_s22, %s7525_s1 }
   0x7   :  { %p6454_p2 = pnand %p6452_p1, %p6449_p0 }
   0x9   :  { %6457 = shalt.err (!%p6454_p2)
}
   0xa   :  { %s6458_s27 = scalar_lea.vmem %s32_s19, 3584  ;;  %p6463_p4 = scmp.lt.s32.totalorder %s32_s19, %s32_s19 }
   0xb   :  { %p6459_p3 = scmp.ne.s32.totalorder %s32_s19, %s6458_s27  ;;  %p6464_p5 = scmp.lt.s32.totalorder %s6458_s27, %s6458_s27 }
   0xd   :  { %p6465_p6 = por %p6464_p5, %p6463_p4 }
   0xf   :  { %p6466_p7 = pnand %p6465_p6, %p6459_p3 }
  0x11   :  { %6469 = shalt.err (!%p6466_p7)
}
  0x12   :  { %s6567_s28 = smov 896   ;;  %s6568_s29 = smov 56  }
  0x13   :  { %37 = dma.hbm_to_vmem [thread:$0]  %s7525_s1, 3584, %s32_s19, [#allocation6], %s6567_s28, %s6567_s28, %s6568_s29  }
  0x14   :  { %s6569_s7 = smov [#allocation2]   ;;  %s6470_s11 = scalar_lea.hbm %s7524_s0, 256 }
  0x15   :  { %s19_s8 = sshll.u32 %s6569_s7, 4  ;;  %p6471_p8 = scmp.ne.s32.totalorder %s7524_s0, %s6470_s11  ;;  %s20_s8 = int_to_ptr.vmem [resolvable:$true] %s19_s8 }
  0x16   :  { %p6474_p9 = scmp.lt.u32.totalorder %s6470_s11, %s7524_s0 }
  0x18   :  { %p6476_p10 = pnand %p6474_p9, %p6471_p8 }
  0x1a   :  { %6479 = shalt.err (!%p6476_p10)
}
  0x1b   :  { %s6480_s16 = scalar_lea.vmem %s20_s8, 256  ;;  %p6485_p12 = scmp.lt.s32.totalorder %s20_s8, %s20_s8 }
  0x1c   :  { %p6481_p11 = scmp.ne.s32.totalorder %s20_s8, %s6480_s16  ;;  %p6486_p13 = scmp.lt.s32.totalorder %s6480_s16, %s6480_s16 }
  0x1e   :  { %p6487_p0 = por %p6486_p13, %p6485_p12 }
  0x20   :  { %p6488_p1 = pnand %p6487_p0, %p6481_p11 }
  0x22   :  { %6491 = shalt.err (!%p6488_p1)
}
  0x23   :  { %s6570_s1 = smov 128   ;;  %s6571_s17 = smov 8  }
  0x24   :  { %25 = dma.hbm_to_vmem [thread:$0]  %s7524_s0, 256, %s20_s8, [#allocation3], %s6570_s1, %s6570_s1, %s6571_s17  }
  0x25   :  { %s6572_s20 = smov [#allocation7]   ;;  %s6573_s22 = smov [#allocation8]  }
  0x26   :  { %s43_s21 = sshll.u32 %s6572_s20, 4  ;;  %s55_s23 = sshll.u32 %s6573_s22, 4  ;;  %s44_s21 = int_to_ptr.vmem [resolvable:$true] %s43_s21  ;;  %s6643_s23 = int_to_ptr.vmem [resolvable:$true] %s55_s23 }
  0x27   :  { %s6492_s26 = scalar_lea.hbm %s7526_s2, 2048 }
  0x28   :  { %p6493_p2 = scmp.ne.s32.totalorder %s7526_s2, %s6492_s26  ;;  %p6496_p3 = scmp.lt.u32.totalorder %s6492_s26, %s7526_s2 }
  0x2a   :  { %p6498_p4 = pnand %p6496_p3, %p6493_p2 }
  0x2c   :  { %6501 = shalt.err (!%p6498_p4)
}
  0x2d   :  { %s6502_s0 = scalar_lea.vmem %s44_s21, 2048  ;;  %p6507_p6 = scmp.lt.s32.totalorder %s44_s21, %s44_s21 }
  0x2e   :  { %p6503_p5 = scmp.ne.s32.totalorder %s44_s21, %s6502_s0  ;;  %p6508_p7 = scmp.lt.s32.totalorder %s6502_s0, %s6502_s0 }
  0x30   :  { %p6509_p8 = por %p6508_p7, %p6507_p6 }
  0x32   :  { %p6510_p9 = pnand %p6509_p8, %p6503_p5 }
  0x34   :  { %6513 = shalt.err (!%p6510_p9)
}
  0x35   :  { %49 = dma.hbm_to_vmem [thread:$0]  %s7526_s2, 2048, %s44_s21, [#allocation6], %s6570_s1, %s6570_s1, %s6571_s17  }
  0x36   :  { %s6514_s10 = scalar_lea.hbm %s7527_s3, 256 }
  0x37   :  { %p6515_p10 = scmp.ne.s32.totalorder %s7527_s3, %s6514_s10  ;;  %p6518_p11 = scmp.lt.u32.totalorder %s6514_s10, %s7527_s3 }
  0x39   :  { %p6520_p12 = pnand %p6518_p11, %p6515_p10 }
  0x3b   :  { %6523 = shalt.err (!%p6520_p12)
}
  0x3c   :  { %s6524_s15 = scalar_lea.vmem %s6643_s23, 256  ;;  %p6529_p0 = scmp.lt.s32.totalorder %s6643_s23, %s6643_s23 }
  0x3d   :  { %p6525_p13 = scmp.ne.s32.totalorder %s6643_s23, %s6524_s15  ;;  %p6530_p1 = scmp.lt.s32.totalorder %s6524_s15, %s6524_s15 }
  0x3f   :  { %p6531_p2 = por %p6530_p1, %p6529_p0 }
  0x41   :  { %p6532_p3 = pnand %p6531_p2, %p6525_p13 }
  0x43   :  { %6535 = shalt.err (!%p6532_p3)
}
  0x44   :  { %61 = dma.hbm_to_vmem [thread:$0]  %s7527_s3, 256, %s6643_s23, [#allocation9], %s6570_s1, %s6570_s1, %s6571_s17  }
  0x45   :  { %6558 = dma.done.wait [#allocation3], 256  }
  0x46   :  { %6559 = vsyncadd [#allocation3], 4294967040 }
  0x47   :  { %6560 = dma.done.wait [#allocation6], 5632  }
  0x48   :  { %6561 = vsyncadd [#allocation6], 4294961664 }
  0x49   :  { %6562 = dma.done.wait [#allocation9], 256  }
  0x4a   :  { %6563 = vsyncadd [#allocation9], 4294967040  ;;  %vm80_vm0 = vcmask 261120   ;;  %v76_v0 = vld [vmem:[#allocation2] sm:$0xff]  ;;  %v77_v1 = vld [vmem:[#allocation2 + $0x8] sm:$0xff]  ;;  %v108_v22 = vlaneseq  ;;  %s6574_s3 = smov 112  }
  0x4b   :  { %v81_v2 = vsel %vm80_vm0, %v76_v0, 0.0  ;;  %v84_v3 = vsel %vm80_vm0, %v77_v1, 0.0  ;;  %v120_v14 = vld [vmem:[#allocation5] sm:$0xff]  ;;  %v121_v15 = vld [vmem:[#allocation5 + $0x38] sm:$0xff]  ;;  %v122_v16 = vld [vmem:[#allocation5 + $0x70] sm:$0xff]  ;;  %s6575_s18 = smov 120  }
  0x4c   :  { %82 = vadd.xlane.f32.xlu0 %v81_v2  ;;  %v6264_v17 = vpack.c.bf16 %v121_v15, %v120_v14  ;;  %v123_v18 = vld [vmem:[#allocation5 + $0xa8] sm:$0xff]  ;;  %v6684_v26 = vshrl.u32 %v108_v22, 7  ;;  %v78_v29 = vld [vmem:[#allocation8] sm:$0xff]  ;;  %s6576_s19 = smov 104   ;;  %s6577_s20 = smov 96   ;;  %v6578_v50 = vmov 0.0  }
  0x4d   :  { %v6268_v19 = vpack.c.bf16 %v123_v18, %v122_v16  ;;  %6045 = vmatprep.subr.mxu0 %v6578_v50  ;;  %vm6579_vm1 = vmmov 0   ;;  %v6580_v53 = vmov 1983009808   ;;  %v6581_v56 = vmov 1934713408   ;;  %s6582_s21 = smov 64  }
  0x4e   :  { %6265 = vmatprep.subr.bf16.mxu1 %v6264_v17  ;;  %v110_v28 = vsub.s32 0, %v6684_v26  ;;  %v116_v30 = vsub.s32 1, %v6684_v26  ;;  %6047 = vmatprep.mubr.msk.f32.mxu0 %vm6579_vm1, %v6578_v50  ;;  %v230_v54 = vunpack.c.l.s4 %v6580_v53  ;;  %v262_v57 = vunpack.c.l.s4 %v6581_v56  ;;  %s6583_s22 = smov 16   ;;  %s6584_s23 = smov 24  }
  0x4f   :  { %6267 = vmatpush3.bf16.msra.mxu1 %v6264_v17  ;;  %vm1105_vm2 = vcmask 64512   ;;  %vm2684_vm3 = vcmask 130048   ;;  %vm2687_vm4 = vcmask 195584  }
  0x50   :  { %85 = vadd.xlane.f32.xlu0 %v84_v3  ;;  %6269 = vmatprep.subr.bf16.mxu1 %v6268_v19  ;;  %v111_v31 = vrot.slane %v78_v29, %v110_v28  ;;  %v117_v34 = vrot.slane %v78_v29, %v116_v30  ;;  %v231_v58 = vunpack.c.0.s8 %v230_v54  ;;  %v263_v61 = vunpack.c.0.s8 %v262_v57 }
  0x52   :  { %v6763_v62 = vsub.s32 %v231_v58, %v6684_v26 }
  0x53   :  { %6271 = vmatpush3.bf16.msra.mxu1 %v6268_v19 }
  0x54   :  { %6025 = vmatprep.subr.mxu1 %v6578_v50 }
  0xd9   :  { %v83_v4 = vpop.xlane.xlu0 %82 }
  0xda   :  { %v88_v5 = vmul.f32 0.03125, %v83_v4 }
  0xdc   :  { %v90_v6 = vsub.f32 %v76_v0, %v88_v5  ;;  %v6766_v5 = vsub.s32 %v263_v61, %v6684_v26 }
  0xdd   :  { %v86_v7 = vpop.xlane.xlu0 %85 }
  0xde   :  { %v89_v8 = vmul.f32 0.03125, %v86_v7  ;;  %v92_v9 = vmul.f32 %v90_v6, %v90_v6 }
  0xe0   :  { %v91_v10 = vsub.f32 %v77_v1, %v89_v8  ;;  %v94_v11 = vsel %vm80_vm0, %v92_v9, 0.0 }
  0xe1   :  { %95 = vadd.xlane.f32.xlu1 %v94_v11 }
  0xe2   :  { %v93_v12 = vmul.f32 %v91_v10, %v91_v10 }
  0xe4   :  { %v97_v13 = vsel %vm80_vm0, %v93_v12, 0.0 }
  0xe5   :  { %98 = vadd.xlane.f32.xlu1 %v97_v13 }
 0x16e   :  { %v96_v20 = vpop.xlane.xlu1 %95 }
 0x16f   :  { %v100_v21 = vmul.f32 0.03125, %v96_v20 }
 0x171   :  { %v102_v23 = vadd.f32 1e-05, %v100_v21 }
 0x172   :  { %v99_v24 = vpop.xlane.xlu1 %98 }
 0x173   :  { %6364 = vrsqrt.f32 %v102_v23  ;;  %v101_v25 = vmul.f32 0.03125, %v99_v24 }
 0x175   :  { %v103_v27 = vadd.f32 1e-05, %v101_v25 }
 0x177   :  { %6366 = vrsqrt.f32 %v103_v27 }
 0x17d   :  { %v6365_v32 = vpop.eup %6364 }
 0x17e   :  { %v106_v33 = vmul.f32 %v6365_v32, %v90_v6 }
 0x180   :  { %v112_v35 = vmul.f32 %v111_v31, %v106_v33 }
 0x181   :  { %v6367_v36 = vpop.eup %6366 }
 0x182   :  { %v107_v37 = vmul.f32 %v6367_v36, %v91_v10  ;;  %v118_v38 = vadd.f32 %v117_v34, %v112_v35 }
 0x184   :  { %v113_v39 = vmul.f32 %v111_v31, %v107_v37  ;;  %6022 = vmatprep.mubr.msk.f32.mxu1 %vm80_vm0, %v118_v38 }
 0x186   :  { %v119_v40 = vadd.f32 %v117_v34, %v113_v39 }
 0x188   :  { %6023 = vmatmul.mubr.msk.f32.vlgmr.msra.gmra.mrb[0].mxu1 %vm80_vm0, %v119_v40 }
 0x189   :  { %6027 = vmatprep.mubr.msk.f32.mxu1 %vm6579_vm1, %v6578_v50 }
 0x25b   :  { %v6694_v41 = vpop.f32.mrb[0].mxu1 }
 0x25c   :  { %v6696_v42 = vpop.f32.mrb[1].mxu1  ;;  %v6744_v49 = vmul.f32 0.35355338, %v6694_v41 }
 0x25d   :  { %505 = vrot.lane.b32.xlu1 %v6696_v42, %s6574_s3  ;;  %501 = vrot.lane.b32.xlu0 %v6696_v42, %s6575_s18  ;;  %v6711_v43 = vmul.f32 0.35355338, %v6696_v42 }
 0x261   :  { %509 = vrot.lane.b32.xlu1 %v6696_v42, %s6576_s19  ;;  %507 = vrot.lane.b32.xlu0 %v6694_v41, %s6574_s3 }
 0x265   :  { %503 = vrot.lane.b32.xlu1 %v6694_v41, %s6575_s18  ;;  %513 = vrot.lane.b32.xlu0 %v6696_v42, %s6577_s20 }
 0x269   :  { %511 = vrot.lane.b32.xlu1 %v6694_v41, %s6576_s19  ;;  %209 = vrot.lane.b32.xlu0 %v6711_v43, %s6575_s18 }
 0x2cf   :  { %v6717_v44 = vpop.permute.xlu1 %505  ;;  %v6719_v45 = vpop.permute.xlu0 %501 }
 0x2d0   :  { %517 = vrot.lane.b32.xlu1 %v6719_v45, %s6577_s20  ;;  %521 = vrot.lane.b32.xlu0 %v6717_v44, %s6577_s20 }
 0x2d3   :  { %v6725_v46 = vpop.permute.xlu1 %509  ;;  %v6748_v51 = vpop.permute.xlu0 %507 }
 0x2d4   :  { %525 = vrot.lane.b32.xlu1 %v6725_v46, %s6577_s20  ;;  %221 = vrot.lane.b32.xlu0 %v6711_v43, %s6576_s19 }
 0x2d7   :  { %v6731_v47 = vpop.permute.xlu1 %503  ;;  %v514_v52 = vpop.permute.xlu0 %513 }
 0x2d8   :  { %215 = vrot.lane.b32.xlu1 %v6711_v43, %s6574_s3  ;;  %519 = vrot.lane.b32.xlu0 %v6731_v47, %s6577_s20 }
 0x2db   :  { %v6737_v48 = vpop.permute.xlu1 %511  ;;  %v210_v55 = vpop.permute.xlu0 %209 }
 0x2dc   :  { %515 = vrot.lane.b32.xlu1 %v6694_v41, %s6577_s20  ;;  %527 = vrot.lane.b32.xlu0 %v6737_v48, %s6577_s20 }
 0x2e0   :  { %523 = vrot.lane.b32.xlu1 %v6748_v51, %s6577_s20  ;;  %217 = vrot.lane.b32.xlu0 %v6744_v49, %s6574_s3 }
 0x2e4   :  { %211 = vrot.lane.b32.xlu1 %v6744_v49, %s6575_s18 }
 0x2e8   :  { %223 = vrot.lane.b32.xlu1 %v6744_v49, %s6576_s19 }
 0x342   :  { %v518_v59 = vpop.permute.xlu1 %517  ;;  %v522_v60 = vpop.permute.xlu0 %521 }
 0x343   :  { %v537_v63 = vcombine.low %v514_v52, %v522_v60  ;;  %v538_v0 = vcombine.high %v514_v52, %v522_v60 }
 0x345   :  { %v545_v6 = vrot.slane %v537_v63, %v6763_v62  ;;  %v552_v7 = vrot.slane %v538_v0, %v6763_v62 }
 0x346   :  { %v526_v1 = vpop.permute.xlu1 %525  ;;  %v222_v2 = vpop.permute.xlu0 %221 }
 0x347   :  { %v553_v3 = vcombine.low %v518_v59, %v526_v1  ;;  %v554_v4 = vcombine.high %v518_v59, %v526_v1  ;;  %v243_v10 = vcombine.low %v210_v55, %v222_v2  ;;  %v244_v11 = vcombine.high %v210_v55, %v222_v2 }
 0x349   :  { %v561_v8 = vrot.slane %v553_v3, %v6763_v62  ;;  %v568_v9 = vrot.slane %v554_v4, %v6763_v62  ;;  %v251_v24 = vrot.slane %v243_v10, %v6763_v62  ;;  %v258_v25 = vrot.slane %v244_v11, %v6763_v62 }
 0x34a   :  { %v216_v12 = vpop.permute.xlu1 %215  ;;  %v520_v17 = vpop.permute.xlu0 %519 }
 0x34b   :  { %v569_v13 = vcombine.low %v545_v6, %v561_v8  ;;  %v570_v14 = vcombine.high %v545_v6, %v561_v8  ;;  %v585_v15 = vcombine.low %v552_v7, %v568_v9  ;;  %v586_v16 = vcombine.high %v552_v7, %v568_v9 }
 0x34c   :  { %v227_v18 = vcombine.low %v6711_v43, %v216_v12  ;;  %v228_v19 = vcombine.high %v6711_v43, %v216_v12 }
 0x34d   :  { %v577_v20 = vrot.slane %v569_v13, %v6766_v5  ;;  %v584_v21 = vrot.slane %v570_v14, %v6766_v5  ;;  %v593_v22 = vrot.slane %v585_v15, %v6766_v5  ;;  %v600_v23 = vrot.slane %v586_v16, %v6766_v5 }
 0x34e   :  { %v235_v27 = vrot.slane %v227_v18, %v6763_v62  ;;  %v242_v29 = vrot.slane %v228_v19, %v6763_v62  ;;  %v516_v31 = vpop.permute.xlu1 %515  ;;  %v528_v54 = vpop.permute.xlu0 %527 }
 0x34f   :  { %v673_v32 = vcombine.low %v577_v20, %v584_v21  ;;  %v5815_v33 = vcombine.high %v577_v20, %v584_v21  ;;  %v689_v34 = vcombine.low %v593_v22, %v600_v23  ;;  %v5816_v35 = vcombine.high %v593_v22, %v600_v23 }
 0x350   :  { %v259_v36 = vcombine.low %v235_v27, %v251_v24  ;;  %v260_v37 = vcombine.high %v235_v27, %v251_v24  ;;  %v275_v38 = vcombine.low %v242_v29, %v258_v25  ;;  %v276_v39 = vcombine.high %v242_v29, %v258_v25 }
 0x351   :  { %v6783_v40 = vrot.slane %v673_v32, %v6763_v62  ;;  %v6786_v43 = vrot.slane %v5815_v33, %v6763_v62  ;;  %v6789_v52 = vrot.slane %v689_v34, %v6763_v62  ;;  %v6792_v53 = vrot.slane %v5816_v35, %v6763_v62 }
 0x352   :  { %v267_v55 = vrot.slane %v259_v36, %v6766_v5  ;;  %v274_v56 = vrot.slane %v260_v37, %v6766_v5  ;;  %v283_v57 = vrot.slane %v275_v38, %v6766_v5  ;;  %v290_v58 = vrot.slane %v276_v39, %v6766_v5  ;;  %v524_v59 = vpop.permute.xlu1 %523 }
 0x353   :  { %v705_v60 = vcombine.low %v6783_v40, %v6786_v43  ;;  %v721_v61 = vcombine.low %v6789_v52, %v6792_v53  ;;  %v621_v3 = vcombine.low %v520_v17, %v528_v54  ;;  %v622_v4 = vcombine.high %v520_v17, %v528_v54  ;;  %v218_v17 = vpop.permute.xlu0 %217 }
 0x354   :  { %v363_v63 = vcombine.low %v267_v55, %v274_v56  ;;  %v5811_v0 = vcombine.high %v267_v55, %v274_v56  ;;  %v379_v1 = vcombine.low %v283_v57, %v290_v58  ;;  %v5812_v2 = vcombine.high %v283_v57, %v290_v58 }
 0x355   :  { %v605_v6 = vcombine.low %v516_v31, %v524_v59  ;;  %v606_v7 = vcombine.high %v516_v31, %v524_v59  ;;  %v629_v13 = vrot.slane %v621_v3, %v6763_v62  ;;  %v636_v14 = vrot.slane %v622_v4, %v6763_v62 }
 0x356   :  { %v370_v8 = vrot.slane %v363_v63, %v6763_v62  ;;  %v378_v9 = vrot.slane %v5811_v0, %v6763_v62  ;;  %v386_v10 = vrot.slane %v379_v1, %v6763_v62  ;;  %v394_v11 = vrot.slane %v5812_v2, %v6763_v62  ;;  %v212_v12 = vpop.permute.xlu1 %211 }
 0x357   :  { %v613_v15 = vrot.slane %v605_v6, %v6763_v62  ;;  %v620_v16 = vrot.slane %v606_v7, %v6763_v62  ;;  %v706_v18 = vcombine.high %v6783_v40, %v6786_v43  ;;  %v722_v19 = vcombine.high %v6789_v52, %v6792_v53 }
 0x358   :  { %v395_v20 = vcombine.low %v370_v8, %v378_v9  ;;  %v411_v21 = vcombine.low %v386_v10, %v394_v11  ;;  %v295_v27 = vcombine.low %v6744_v49, %v218_v17  ;;  %v296_v29 = vcombine.high %v6744_v49, %v218_v17 }
 0x359   :  { %v637_v22 = vcombine.low %v613_v15, %v629_v13  ;;  %v638_v23 = vcombine.high %v613_v15, %v629_v13  ;;  %v653_v24 = vcombine.low %v620_v16, %v636_v14  ;;  %v654_v25 = vcombine.high %v620_v16, %v636_v14 }
 0x35a   :  { %v713_v31 = vrot.slane %v705_v60, %v6766_v5  ;;  %v729_v32 = vrot.slane %v721_v61, %v6766_v5  ;;  %v224_v33 = vpop.permute.xlu1 %223  ;;  %v396_v38 = vcombine.high %v370_v8, %v378_v9  ;;  %v412_v39 = vcombine.high %v386_v10, %v394_v11 }
 0x35b   :  { %v645_v34 = vrot.slane %v637_v22, %v6766_v5  ;;  %v652_v35 = vrot.slane %v638_v23, %v6766_v5  ;;  %v661_v36 = vrot.slane %v653_v24, %v6766_v5  ;;  %v668_v37 = vrot.slane %v654_v25, %v6766_v5 }
 0x35c   :  { %v737_v40 = vcombine.low %v713_v31, %v729_v32  ;;  %v311_v43 = vcombine.low %v212_v12, %v224_v33  ;;  %v303_v49 = vrot.slane %v295_v27, %v6763_v62  ;;  %v310_v54 = vrot.slane %v296_v29, %v6763_v62 }
 0x35d   :  { %v741_v52 = vcombine.low %v645_v34, %v652_v35  ;;  %v5817_v53 = vcombine.high %v645_v34, %v652_v35  ;;  %v312_v55 = vcombine.high %v212_v12, %v224_v33  ;;  %v403_v57 = vrot.slane %v395_v20, %v6766_v5 }
 0x35e   :  { %6026 = vmatpush3.xpose.msk.msra.mxu1 %vm1105_vm2, %v737_v40  ;;  %v319_v56 = vrot.slane %v311_v43, %v6763_v62  ;;  %v419_v58 = vrot.slane %v411_v21, %v6766_v5  ;;  %v757_v59 = vcombine.low %v661_v36, %v668_v37  ;;  %v5818_v60 = vcombine.high %v661_v36, %v668_v37 }
 0x35f   :  { %6030 = vmatprep.subr.mxu1 %v6578_v50  ;;  %v720_v61 = vrot.slane %v706_v18, %v6766_v5  ;;  %v736_v63 = vrot.slane %v722_v19, %v6766_v5  ;;  %v326_v0 = vrot.slane %v312_v55, %v6763_v62  ;;  %v738_v4 = vcombine.high %v713_v31, %v729_v32 }
 0x360   :  { %v327_v1 = vcombine.low %v303_v49, %v319_v56  ;;  %v328_v2 = vcombine.high %v303_v49, %v319_v56  ;;  %v427_v3 = vcombine.low %v403_v57, %v419_v58  ;;  %v428_v6 = vcombine.high %v403_v57, %v419_v58 }
 0x361   :  { %v739_v7 = vcombine.low %v720_v61, %v736_v63  ;;  %v410_v8 = vrot.slane %v396_v38, %v6766_v5  ;;  %v343_v11 = vcombine.low %v310_v54, %v326_v0  ;;  %v344_v12 = vcombine.high %v310_v54, %v326_v0 }
 0x362   :  { %v335_v9 = vrot.slane %v327_v1, %v6766_v5  ;;  %v342_v10 = vrot.slane %v328_v2, %v6766_v5  ;;  %6028 = vmatmul.mubr.msk.f32.vlgmr.msra.gmra.mrb[2].mxu1 %vm1105_vm2, %v427_v3  ;;  %v426_v13 = vrot.slane %v412_v39, %v6766_v5  ;;  %v748_v14 = vrot.slane %v741_v52, %v6763_v62 }
 0x363   :  { %6031 = vmatpush3.xpose.msk.msra.mxu1 %vm1105_vm2, %v738_v4  ;;  %6032 = vmatprep.mubr.msk.f32.mxu1 %vm6579_vm1, %v6578_v50  ;;  %v756_v15 = vrot.slane %v5817_v53, %v6763_v62  ;;  %v351_v16 = vrot.slane %v343_v11, %v6766_v5  ;;  %v358_v17 = vrot.slane %v344_v12, %v6766_v5 }
 0x364   :  { %v431_v18 = vcombine.low %v335_v9, %v342_v10  ;;  %v5813_v19 = vcombine.high %v335_v9, %v342_v10  ;;  %6035 = vmatprep.subr.mxu1 %v6578_v50  ;;  %v764_v20 = vrot.slane %v757_v59, %v6763_v62  ;;  %v772_v21 = vrot.slane %v5818_v60, %v6763_v62 }
 0x365   :  { %v773_v22 = vcombine.low %v748_v14, %v756_v15  ;;  %v774_v23 = vcombine.high %v748_v14, %v756_v15  ;;  %v447_v27 = vcombine.low %v351_v16, %v358_v17  ;;  %v5814_v29 = vcombine.high %v351_v16, %v358_v17 }
 0x366   :  { %v438_v24 = vrot.slane %v431_v18, %v6763_v62  ;;  %v446_v25 = vrot.slane %v5813_v19, %v6763_v62  ;;  %6033 = vmatmul.mubr.msk.f32.vlgmr.msra.gmra.mrb[4].mxu1 %vm1105_vm2, %v428_v6  ;;  %v789_v32 = vcombine.low %v764_v20, %v772_v21  ;;  %v790_v33 = vcombine.high %v764_v20, %v772_v21 }
 0x367   :  { %6036 = vmatpush3.xpose.msk.msra.mxu1 %vm1105_vm2, %v739_v7  ;;  %6037 = vmatprep.mubr.msk.f32.mxu1 %vm6579_vm1, %v6578_v50  ;;  %v781_v31 = vrot.slane %v773_v22, %v6766_v5  ;;  %v454_v34 = vrot.slane %v447_v27, %v6763_v62  ;;  %v462_v35 = vrot.slane %v5814_v29, %v6763_v62 }
 0x368   :  { %6040 = vmatprep.subr.mxu1 %v6578_v50  ;;  %v429_v36 = vcombine.low %v410_v8, %v426_v13  ;;  %v464_v37 = vcombine.high %v438_v24, %v446_v25  ;;  %v740_v38 = vcombine.high %v720_v61, %v736_v63  ;;  %v797_v39 = vrot.slane %v789_v32, %v6766_v5 }
 0x369   :  { %v463_v40 = vcombine.low %v438_v24, %v446_v25  ;;  %v480_v43 = vcombine.high %v454_v34, %v462_v35  ;;  %v479_v52 = vcombine.low %v454_v34, %v462_v35  ;;  %v788_v53 = vrot.slane %v774_v23, %v6766_v5 }
 0x36a   :  { %6038 = vmatmul.mubr.msk.f32.vlgmr.msra.gmra.mrb[6].mxu1 %vm1105_vm2, %v429_v36  ;;  %v805_v49 = vcombine.low %v781_v31, %v797_v39  ;;  %v804_v55 = vrot.slane %v790_v33, %v6766_v5  ;;  %v430_v56 = vcombine.high %v410_v8, %v426_v13  ;;  %v806_v58 = vcombine.high %v781_v31, %v797_v39 }
 0x36b   :  { %6041 = vmatpush3.xpose.msk.msra.mxu1 %vm1105_vm2, %v740_v38  ;;  %6042 = vmatprep.mubr.msk.f32.mxu1 %vm6579_vm1, %v6578_v50  ;;  %v471_v54 = vrot.slane %v463_v40, %v6766_v5  ;;  %v487_v57 = vrot.slane %v479_v52, %v6766_v5  ;;  %v478_v59 = vrot.slane %v464_v37, %v6766_v5 }
 0x36c   :  { %6050 = vmatprep.subr.mxu1 %v6578_v50  ;;  %6046 = vmatpush3.xpose.msk.msra.mxu0 %vm1105_vm2, %v805_v49  ;;  %v494_v63 = vrot.slane %v480_v43, %v6766_v5  ;;  %v807_v0 = vcombine.low %v788_v53, %v804_v55  ;;  %v808_v1 = vcombine.high %v788_v53, %v804_v55 }
 0x36d   :  { %6055 = vmatprep.subr.mxu0 %v6578_v50  ;;  %v495_v60 = vcombine.low %v471_v54, %v487_v57  ;;  %v496_v61 = vcombine.high %v471_v54, %v487_v57 }
 0x36e   :  { %6043 = vmatmul.mubr.msk.f32.vlgmr.msra.gmra.mrb[8].mxu1 %vm1105_vm2, %v430_v56  ;;  %v497_v2 = vcombine.low %v478_v59, %v494_v63  ;;  %v498_v3 = vcombine.high %v478_v59, %v494_v63 }
 0x36f   :  { %6051 = vmatpush3.xpose.msk.msra.mxu1 %vm1105_vm2, %v806_v58  ;;  %6052 = vmatprep.mubr.msk.f32.mxu1 %vm6579_vm1, %v6578_v50 }
 0x370   :  { %6060 = vmatprep.subr.mxu1 %v6578_v50  ;;  %6048 = vmatmul.mubr.msk.f32.vlgmr.msra.gmra.mrb[0].mxu0 %vm1105_vm2, %v495_v60 }
 0x371   :  { %6056 = vmatpush3.xpose.msk.msra.mxu0 %vm1105_vm2, %v807_v0  ;;  %6057 = vmatprep.mubr.msk.f32.mxu0 %vm6579_vm1, %v6578_v50 }
 0x372   :  { %6053 = vmatmul.mubr.msk.f32.vlgmr.msra.gmra.mrb[10].mxu1 %vm1105_vm2, %v496_v61  ;;  %6065 = vmatprep.subr.mxu0 %v6578_v50 }
 0x373   :  { %6061 = vmatpush3.xpose.msk.msra.mxu1 %vm1105_vm2, %v808_v1  ;;  %6062 = vmatprep.mubr.msk.f32.mxu1 %vm6579_vm1, %v6578_v50 }
 0x374   :  { %6058 = vmatmul.mubr.msk.f32.vlgmr.msra.gmra.mrb[2].mxu0 %vm1105_vm2, %v497_v2  ;;  %6070 = vmatprep.subr.mxu1 %v6578_v50 }
 0x375   :  { %6067 = vmatprep.mubr.msk.f32.mxu0 %vm6579_vm1, %v6578_v50 }
 0x376   :  { %6063 = vmatmul.mubr.msk.f32.vlgmr.msra.gmra.mrb[12].mxu1 %vm1105_vm2, %v498_v3 }
 0x377   :  { %6072 = vmatprep.mubr.msk.f32.mxu1 %vm6579_vm1, %v6578_v50 }
 0x435   :  { %v1178_v4 = vpop.f32.mrb[2].mxu1 }
 0x436   :  { %v6029_v6 = vpop.f32.mrb[3].mxu1  ;;  %v1714_v21 = vsel %vm1105_vm2, %v1178_v4, -inf }
 0x439   :  { %v1254_v7 = vpop.f32.mrb[4].mxu1 }
 0x43a   :  { %v6034_v8 = vpop.f32.mrb[5].mxu1  ;;  %v1717_v9 = vsel %vm1105_vm2, %v1254_v7, -inf }
 0x43b   :  { %1718 = vmax.xlane.f32.xlu1 %v1717_v9 }
 0x43d   :  { %v1330_v10 = vpop.f32.mrb[6].mxu1 }
 0x43e   :  { %v6039_v11 = vpop.f32.mrb[7].mxu1  ;;  %v1720_v25 = vsel %vm1105_vm2, %v1330_v10, -inf }
 0x441   :  { %v1406_v12 = vpop.f32.mrb[8].mxu1 }
 0x442   :  { %v6044_v13 = vpop.f32.mrb[9].mxu1  ;;  %v1723_v27 = vsel %vm1105_vm2, %v1406_v12, -inf }
 0x443   :  { %v1482_v14 = vpop.f32.mrb[0].mxu0 }
 0x444   :  { %v6049_v15 = vpop.f32.mrb[1].mxu0  ;;  %v1726_v16 = vsel %vm1105_vm2, %v1482_v14, -inf }
 0x445   :  { %v6894_v17 = vpop.f32.mrb[10].mxu1  ;;  %1727 = vmax.xlane.f32.xlu0 %v1726_v16 }
 0x446   :  { %v6054_v18 = vpop.f32.mrb[11].mxu1  ;;  %v1729_v29 = vsel %vm1105_vm2, %v6894_v17, -inf }
 0x447   :  { %v1634_v19 = vpop.f32.mrb[2].mxu0 }
 0x448   :  { %v6059_v20 = vpop.f32.mrb[3].mxu0  ;;  %v1732_v24 = vsel %vm1105_vm2, %v1634_v19, -inf }
 0x449   :  { %v6897_v22 = vpop.f32.mrb[12].mxu1  ;;  %1715 = vmax.xlane.f32.xlu0 %v1714_v21 }
 0x44a   :  { %v6064_v23 = vpop.f32.mrb[13].mxu1 }
 0x44c   :  { %813 = vrot.lane.b32.xlu1 %v6719_v45, %s6582_s21  ;;  %v1735_v45 = vsel %vm1105_vm2, %v6897_v22, -inf }
 0x44d   :  { %1733 = vmax.xlane.f32.xlu0 %v1732_v24 }
 0x450   :  { %817 = vrot.lane.b32.xlu1 %v6717_v44, %s6582_s21 }
 0x451   :  { %1721 = vmax.xlane.f32.xlu0 %v1720_v25 }
 0x455   :  { %1724 = vmax.xlane.f32.xlu0 %v1723_v27 }
 0x46b   :  { %809 = vrot.lane.b32.xlu0 %v6696_v42, %s6582_s21 }
 0x474   :  { %1730 = vmax.xlane.f32.xlu1 %v1729_v29 }
 0x478   :  { %1736 = vmax.xlane.f32.xlu1 %v1735_v45 }
 0x489   :  { %821 = vrot.lane.b32.xlu1 %v6725_v46, %s6582_s21 }
 0x4c8   :  { %v1719_v44 = vpop.xlane.xlu1 %1718 }
 0x4c9   :  { %v1739_v31 = vsub.f32 %v1254_v7, %v1719_v44 }
 0x4cb   :  { %v1748_v32 = vmul.f32 1.442695, %v1739_v31 }
 0x4cd   :  { %6368 = vpow2.f32 %v1748_v32 }
 0x4d2   :  { %v1728_v33 = vpop.xlane.xlu0 %1727 }
 0x4d3   :  { %v1742_v34 = vsub.f32 %v1482_v14, %v1728_v33 }
 0x4d5   :  { %v1754_v35 = vmul.f32 1.442695, %v1742_v34 }
 0x4d6   :  { %v1716_v36 = vpop.xlane.xlu0 %1715 }
 0x4d7   :  { %v6914_v42 = vpop.eup %6368  ;;  %6370 = vpow2.f32 %v1754_v35  ;;  %v1738_v37 = vsub.f32 %v1178_v4, %v1716_v36  ;;  %v814_v4 = vpop.permute.xlu1 %813 }
 0x4d8   :  { %v1765_v38 = vsel %vm1105_vm2, %v6914_v42, 0.0 }
 0x4d9   :  { %v1746_v39 = vmul.f32 1.442695, %v1738_v37  ;;  %1766 = vadd.xlane.f32.xlu1 %v1765_v38 }
 0x4da   :  { %v1734_v40 = vpop.xlane.xlu0 %1733 }
 0x4db   :  { %6372 = vpow2.f32 %v1746_v39  ;;  %v1744_v46 = vsub.f32 %v1634_v19, %v1734_v40  ;;  %v818_v6 = vpop.permute.xlu1 %817 }
 0x4dd   :  { %v1758_v43 = vmul.f32 1.442695, %v1744_v46 }
 0x4de   :  { %v1722_v52 = vpop.xlane.xlu0 %1721 }
 0x4df   :  { %6374 = vpow2.f32 %v1758_v43  ;;  %v1740_v53 = vsub.f32 %v1330_v10, %v1722_v52 }
 0x4e1   :  { %v6918_v49 = vpop.eup %6370  ;;  %v1750_v54 = vmul.f32 1.442695, %v1740_v53 }
 0x4e2   :  { %v1725_v55 = vpop.xlane.xlu0 %1724  ;;  %v1774_v56 = vsel %vm1105_vm2, %v6918_v49, 0.0 }
 0x4e3   :  { %6376 = vpow2.f32 %v1750_v54  ;;  %v1741_v57 = vsub.f32 %v1406_v12, %v1725_v55  ;;  %1775 = vadd.xlane.f32.xlu0 %v1774_v56 }
 0x4e5   :  { %v6922_v58 = vpop.eup %6372  ;;  %v1752_v59 = vmul.f32 1.442695, %v1741_v57 }
 0x4e6   :  { %v1762_v60 = vsel %vm1105_vm2, %v6922_v58, 0.0  ;;  %v810_v10 = vpop.permute.xlu0 %809 }
 0x4e7   :  { %6378 = vpow2.f32 %v1752_v59  ;;  %1763 = vadd.xlane.f32.xlu0 %v1762_v60  ;;  %v833_v13 = vcombine.low %v810_v10, %v818_v6  ;;  %v834_v14 = vcombine.high %v810_v10, %v818_v6 }
 0x4e9   :  { %v6926_v61 = vpop.eup %6374  ;;  %v841_v20 = vrot.slane %v833_v13, %v6763_v62  ;;  %v848_v21 = vrot.slane %v834_v14, %v6763_v62 }
 0x4ea   :  { %v1780_v63 = vsel %vm1105_vm2, %v6926_v61, 0.0 }
 0x4eb   :  { %1781 = vadd.xlane.f32.xlu0 %v1780_v63 }
 0x4ed   :  { %v6930_v0 = vpop.eup %6376 }
 0x4ee   :  { %v1768_v1 = vsel %vm1105_vm2, %v6930_v0, 0.0 }
 0x4ef   :  { %1769 = vadd.xlane.f32.xlu0 %v1768_v1 }
 0x4f1   :  { %v6934_v2 = vpop.eup %6378 }
 0x4f2   :  { %v1771_v3 = vsel %vm1105_vm2, %v6934_v2, 0.0 }
 0x4f3   :  { %1772 = vadd.xlane.f32.xlu1 %v1771_v3 }
 0x501   :  { %v1731_v7 = vpop.xlane.xlu1 %1730 }
 0x502   :  { %v1743_v8 = vsub.f32 %v6894_v17, %v1731_v7 }
 0x504   :  { %v1756_v9 = vmul.f32 1.442695, %v1743_v8 }
 0x505   :  { %v1737_v11 = vpop.xlane.xlu1 %1736 }
 0x506   :  { %6380 = vpow2.f32 %v1756_v9  ;;  %v1745_v12 = vsub.f32 %v6897_v22, %v1737_v11 }
 0x508   :  { %v1760_v15 = vmul.f32 1.442695, %v1745_v12 }
 0x509   :  { %v822_v16 = vpop.permute.xlu1 %821 }
 0x50a   :  { %6382 = vpow2.f32 %v1760_v15  ;;  %v849_v18 = vcombine.low %v814_v4, %v822_v16  ;;  %v850_v19 = vcombine.high %v814_v4, %v822_v16 }
 0x50c   :  { %v857_v23 = vrot.slane %v849_v18, %v6763_v62  ;;  %v864_v17 = vrot.slane %v850_v19, %v6763_v62 }
 0x50e   :  { %v865_v24 = vcombine.low %v841_v20, %v857_v23  ;;  %v866_v25 = vcombine.high %v841_v20, %v857_v23  ;;  %v881_v27 = vcombine.low %v848_v21, %v864_v17  ;;  %v882_v29 = vcombine.high %v848_v21, %v864_v17 }
 0x510   :  { %v6944_v22 = vpop.eup %6380  ;;  %v873_v45 = vrot.slane %v865_v24, %v6766_v5  ;;  %v880_v44 = vrot.slane %v866_v25, %v6766_v5  ;;  %v889_v31 = vrot.slane %v881_v27, %v6766_v5  ;;  %v896_v32 = vrot.slane %v882_v29, %v6766_v5 }
 0x511   :  { %v1777_v33 = vsel %vm1105_vm2, %v6944_v22, 0.0 }
 0x512   :  { %v969_v34 = vcombine.low %v873_v45, %v880_v44  ;;  %v5819_v35 = vcombine.high %v873_v45, %v880_v44  ;;  %v985_v36 = vcombine.low %v889_v31, %v896_v32  ;;  %v5820_v37 = vcombine.high %v889_v31, %v896_v32  ;;  %1778 = vadd.xlane.f32.xlu1 %v1777_v33 }
 0x514   :  { %v6952_v38 = vpop.eup %6382  ;;  %v976_v39 = vrot.slane %v969_v34, %v6763_v62  ;;  %v984_v40 = vrot.slane %v5819_v35, %v6763_v62  ;;  %v992_v46 = vrot.slane %v985_v36, %v6763_v62  ;;  %v1000_v43 = vrot.slane %v5820_v37, %v6763_v62 }
 0x515   :  { %v1783_v52 = vsel %vm1105_vm2, %v6952_v38, 0.0 }
 0x516   :  { %1784 = vadd.xlane.f32.xlu0 %v1783_v52  ;;  %v1001_v53 = vcombine.low %v976_v39, %v984_v40  ;;  %v1017_v54 = vcombine.low %v992_v46, %v1000_v43  ;;  %v1002_v55 = vcombine.high %v976_v39, %v984_v40  ;;  %v1018_v56 = vcombine.high %v992_v46, %v1000_v43 }
 0x518   :  { %v1009_v57 = vrot.slane %v1001_v53, %v6766_v5  ;;  %v1025_v59 = vrot.slane %v1017_v54, %v6766_v5  ;;  %v1016_v60 = vrot.slane %v1002_v55, %v6766_v5  ;;  %v1032_v63 = vrot.slane %v1018_v56, %v6766_v5 }
 0x51a   :  { %v1033_v1 = vcombine.low %v1009_v57, %v1025_v59  ;;  %v1034_v3 = vcombine.high %v1009_v57, %v1025_v59  ;;  %v1036_v4 = vcombine.high %v1016_v60, %v1032_v63  ;;  %v1035_v6 = vcombine.low %v1016_v60, %v1032_v63 }
 0x51c   :  { %6066 = vmatpush3.msra.mxu0 %v1033_v1  ;;  %6071 = vmatpush3.msra.mxu1 %v1034_v3 }
 0x51d   :  { %6080 = vmatprep.subr.mxu1 %v6578_v50  ;;  %6075 = vmatprep.subr.mxu0 %v6578_v50 }
 0x523   :  { %815 = vrot.lane.b32.xlu1 %v6731_v47, %s6582_s21 }
 0x527   :  { %819 = vrot.lane.b32.xlu1 %v6748_v51, %s6582_s21 }
 0x52b   :  { %823 = vrot.lane.b32.xlu1 %v6737_v48, %s6582_s21 }
 0x52c   :  { %811 = vrot.lane.b32.xlu0 %v6694_v41, %s6582_s21 }
 0x566   :  { %v1767_v7 = vpop.xlane.xlu1 %1766 }
 0x567   :  { %6384 = vrcp.f32 %v1767_v7 }
 0x570   :  { %v1776_v8 = vpop.xlane.xlu0 %1775 }
 0x571   :  { %v6385_v9 = vpop.eup %6384 }
 0x572   :  { %v1795_v10 = vmul.f32 %v6385_v9, %v6914_v42 }
 0x574   :  { %6073 = vmatmul.mubr.msk.f32.vlgmr.msra.gmra.mrb[14].mxu1 %vm1105_vm2, %v1795_v10  ;;  %v1764_v11 = vpop.xlane.xlu0 %1763 }
 0x575   :  { %6081 = vmatpush3.msra.mxu1 %v1036_v4  ;;  %6386 = vrcp.f32 %v1764_v11  ;;  %6082 = vmatprep.mubr.msk.f32.mxu1 %vm6579_vm1, %v6578_v50 }
 0x576   :  { %6090 = vmatprep.subr.mxu1 %v6578_v50 }
 0x578   :  { %v1782_v47 = vpop.xlane.xlu0 %1781 }
 0x57c   :  { %v1770_v48 = vpop.xlane.xlu0 %1769 }
 0x57d   :  { %6388 = vrcp.f32 %v1770_v48 }
 0x57f   :  { %v6387_v41 = vpop.eup %6386 }
 0x580   :  { %v1794_v51 = vmul.f32 %v6387_v41, %v6922_v58  ;;  %v1773_v12 = vpop.xlane.xlu1 %1772 }
 0x581   :  { %6390 = vrcp.f32 %v1773_v12 }
 0x582   :  { %6068 = vmatmul.mubr.msk.f32.vlgmr.msra.gmra.mrb[4].mxu0 %vm1105_vm2, %v1794_v51  ;;  %6392 = vrcp.f32 %v1776_v8 }
 0x583   :  { %6076 = vmatpush3.msra.mxu0 %v1035_v6  ;;  %6077 = vmatprep.mubr.msk.f32.mxu0 %vm6579_vm1, %v6578_v50 }
 0x584   :  { %6085 = vmatprep.subr.mxu0 %v6578_v50 }
 0x587   :  { %v6389_v42 = vpop.eup %6388 }
 0x588   :  { %v1796_v13 = vmul.f32 %v6389_v42, %v6930_v0 }
 0x58a   :  { %6078 = vmatmul.mubr.msk.f32.vlgmr.msra.gmra.mrb[6].mxu0 %vm1105_vm2, %v1796_v13 }
 0x58b   :  { %v6391_v14 = vpop.eup %6390  ;;  %6087 = vmatprep.mubr.msk.f32.mxu0 %vm6579_vm1, %v6578_v50 }
 0x58c   :  { %v1797_v58 = vmul.f32 %v6391_v14, %v6934_v2  ;;  %v6393_v55 = vpop.eup %6392 }
 0x58d   :  { %v1798_v11 = vmul.f32 %v6393_v55, %v6918_v49 }
 0x58e   :  { %6083 = vmatmul.mubr.msk.f32.vlgmr.msra.gmra.mrb[16].mxu1 %vm1105_vm2, %v1797_v58 }
 0x58f   :  { %6092 = vmatprep.mubr.msk.f32.mxu1 %vm6579_vm1, %v6578_v50 }
 0x59f   :  { %v1779_v15 = vpop.xlane.xlu1 %1778 }
 0x5a0   :  { %6394 = vrcp.f32 %v1779_v15 }
 0x5a1   :  { %6396 = vrcp.f32 %v1782_v47 }
 0x5a3   :  { %v816_v16 = vpop.permute.xlu1 %815  ;;  %v1785_v18 = vpop.xlane.xlu0 %1784 }
 0x5a4   :  { %6398 = vrcp.f32 %v1785_v18 }
 0x5a7   :  { %v820_v19 = vpop.permute.xlu1 %819  ;;  %v812_v20 = vpop.permute.xlu0 %811 }
 0x5a8   :  { %v901_v21 = vcombine.low %v812_v20, %v820_v19  ;;  %v902_v0 = vcombine.high %v812_v20, %v820_v19 }
 0x5aa   :  { %v909_v25 = vrot.slane %v901_v21, %v6763_v62  ;;  %v916_v2 = vrot.slane %v902_v0, %v6763_v62  ;;  %v6395_v63 = vpop.eup %6394 }
 0x5ab   :  { %v824_v23 = vpop.permute.xlu1 %823  ;;  %v6397_v4 = vpop.eup %6396  ;;  %v1799_v47 = vmul.f32 %v6395_v63, %v6944_v22 }
 0x5ac   :  { %v917_v17 = vcombine.low %v816_v16, %v824_v23  ;;  %v918_v24 = vcombine.high %v816_v16, %v824_v23  ;;  %v1800_v51 = vmul.f32 %v6397_v4, %v6926_v61 }
 0x5ae   :  { %v925_v27 = vrot.slane %v917_v17, %v6763_v62  ;;  %v932_v29 = vrot.slane %v918_v24, %v6763_v62  ;;  %v6399_v10 = vpop.eup %6398 }
 0x5af   :  { %v1801_v12 = vmul.f32 %v6399_v10, %v6952_v38 }
 0x5b0   :  { %v933_v45 = vcombine.low %v909_v25, %v925_v27  ;;  %v934_v44 = vcombine.high %v909_v25, %v925_v27  ;;  %v949_v31 = vcombine.low %v916_v2, %v932_v29  ;;  %v950_v32 = vcombine.high %v916_v2, %v932_v29 }
 0x5b2   :  { %v941_v33 = vrot.slane %v933_v45, %v6766_v5  ;;  %v948_v34 = vrot.slane %v934_v44, %v6766_v5  ;;  %v957_v35 = vrot.slane %v949_v31, %v6766_v5  ;;  %v964_v36 = vrot.slane %v950_v32, %v6766_v5 }
 0x5b4   :  { %v1037_v37 = vcombine.low %v941_v33, %v948_v34  ;;  %v5821_v39 = vcombine.high %v941_v33, %v948_v34  ;;  %v1053_v40 = vcombine.low %v957_v35, %v964_v36  ;;  %v5822_v46 = vcombine.high %v957_v35, %v964_v36 }
 0x5b6   :  { %v1044_v43 = vrot.slane %v1037_v37, %v6763_v62  ;;  %v1052_v52 = vrot.slane %v5821_v39, %v6763_v62  ;;  %v1060_v53 = vrot.slane %v1053_v40, %v6763_v62  ;;  %v1068_v54 = vrot.slane %v5822_v46, %v6763_v62 }
 0x5b8   :  { %v1069_v56 = vcombine.low %v1044_v43, %v1052_v52  ;;  %v1085_v57 = vcombine.low %v1060_v53, %v1068_v54  ;;  %v1070_v59 = vcombine.high %v1044_v43, %v1052_v52  ;;  %v1086_v60 = vcombine.high %v1060_v53, %v1068_v54 }
 0x5ba   :  { %v1077_v1 = vrot.slane %v1069_v56, %v6766_v5  ;;  %v1093_v3 = vrot.slane %v1085_v57, %v6766_v5  ;;  %v1084_v6 = vrot.slane %v1070_v59, %v6766_v5  ;;  %v1100_v7 = vrot.slane %v1086_v60, %v6766_v5 }
 0x5bc   :  { %v1101_v8 = vcombine.low %v1077_v1, %v1093_v3  ;;  %v1102_v9 = vcombine.high %v1077_v1, %v1093_v3  ;;  %v1103_v48 = vcombine.low %v1084_v6, %v1100_v7  ;;  %v1104_v41 = vcombine.high %v1084_v6, %v1100_v7 }
 0x5be   :  { %6086 = vmatpush3.msra.mxu0 %v1101_v8  ;;  %6091 = vmatpush3.msra.mxu1 %v1102_v9 }
 0x5bf   :  { %6088 = vmatmul.mubr.msk.f32.vlgmr.msra.gmra.mrb[8].mxu0 %vm1105_vm2, %v1798_v11  ;;  %6093 = vmatmul.mubr.msk.f32.vlgmr.msra.gmra.mrb[18].mxu1 %vm1105_vm2, %v1799_v47 }
 0x5c0   :  { %6095 = vmatprep.subr.mxu0 %v6578_v50  ;;  %6100 = vmatprep.subr.mxu1 %v6578_v50 }
 0x5c1   :  { %6096 = vmatpush3.msra.mxu0 %v1103_v48  ;;  %6101 = vmatpush3.msra.mxu1 %v1104_v41 }
 0x5c2   :  { %6097 = vmatprep.mubr.msk.f32.mxu0 %vm6579_vm1, %v6578_v50  ;;  %6102 = vmatprep.mubr.msk.f32.mxu1 %vm6579_vm1, %v6578_v50 }
 0x5c3   :  { %6098 = vmatmul.mubr.msk.f32.vlgmr.msra.gmra.mrb[10].mxu0 %vm1105_vm2, %v1800_v51  ;;  %6103 = vmatmul.mubr.msk.f32.vlgmr.msra.gmra.mrb[20].mxu1 %vm1105_vm2, %v1801_v12 }
 0x647   :  { %v1944_v49 = vpop.f32.mrb[14].mxu1 }
 0x648   :  { %v6074_v22 = vpop.f32.mrb[15].mxu1 }
 0x655   :  { %v1871_v42 = vpop.f32.mrb[4].mxu0 }
 0x656   :  { %v6069_v13 = vpop.f32.mrb[5].mxu0 }
 0x65d   :  { %v2017_v14 = vpop.f32.mrb[6].mxu0 }
 0x65e   :  { %v2386_v61 = vcombine.low %v1871_v42, %v2017_v14  ;;  %v2387_v58 = vcombine.high %v1871_v42, %v2017_v14  ;;  %v6079_v38 = vpop.f32.mrb[7].mxu0 }
 0x65f   :  { %v2691_v38 = vld [vmem:[#allocation5 + $0x50] sm:$0xff] }
 0x660   :  { %v2394_v20 = vrot.slane %v2386_v61, %v6763_v62  ;;  %v2401_v21 = vrot.slane %v2387_v58, %v6763_v62  ;;  %v2690_v58 = vld [vmem:[#allocation5 + $0x18] sm:$0xff] }
 0x661   :  { %v2090_v15 = vpop.f32.mrb[16].mxu1 }
 0x662   :  { %v2402_v16 = vcombine.low %v1944_v49, %v2090_v15  ;;  %v2403_v18 = vcombine.high %v1944_v49, %v2090_v15  ;;  %v6084_v19 = vpop.f32.mrb[17].mxu1 }
 0x664   :  { %v2410_v0 = vrot.slane %v2402_v16, %v6763_v62  ;;  %v2417_v23 = vrot.slane %v2403_v18, %v6763_v62 }
 0x666   :  { %v2418_v17 = vcombine.low %v2394_v20, %v2410_v0  ;;  %v2419_v24 = vcombine.high %v2394_v20, %v2410_v0  ;;  %v2434_v25 = vcombine.low %v2401_v21, %v2417_v23  ;;  %v2435_v2 = vcombine.high %v2401_v21, %v2417_v23 }
 0x667   :  { %v6272_v20 = vpack.c.bf16 %v2691_v38, %v2690_v58 }
 0x668   :  { %v2426_v27 = vrot.slane %v2418_v17, %v6766_v5  ;;  %v2433_v29 = vrot.slane %v2419_v24, %v6766_v5  ;;  %v2442_v45 = vrot.slane %v2434_v25, %v6766_v5  ;;  %v2449_v44 = vrot.slane %v2435_v2, %v6766_v5  ;;  %v2692_v24 = vld [vmem:[#allocation5 + $0x88] sm:$0xff]  ;;  %v2693_v25 = vld [vmem:[#allocation5 + $0xc0] sm:$0xff] }
 0x669   :  { %6273 = vmatprep.subr.bf16.mxu0 %v6272_v20 }
 0x66a   :  { %v2522_v31 = vcombine.low %v2426_v27, %v2433_v29  ;;  %v5847_v32 = vcombine.high %v2426_v27, %v2433_v29  ;;  %v2538_v33 = vcombine.low %v2442_v45, %v2449_v44  ;;  %v5848_v34 = vcombine.high %v2442_v45, %v2449_v44  ;;  %6275 = vmatpush3.bf16.msra.mxu0 %v6272_v20 }
 0x66b   :  { %v6276_v44 = vpack.c.bf16 %v2693_v25, %v2692_v24  ;;  %v2905_v24 = vld [vmem:[#allocation5 + $0x48] sm:$0xff]  ;;  %v2821_v25 = vld [vmem:[#allocation5 + $0x78] sm:$0xff] }
 0x66c   :  { %v2529_v35 = vrot.slane %v2522_v31, %v6763_v62  ;;  %v2537_v36 = vrot.slane %v5847_v32, %v6763_v62  ;;  %v2545_v37 = vrot.slane %v2538_v33, %v6763_v62  ;;  %v2553_v39 = vrot.slane %v5848_v34, %v6763_v62 }
 0x66d   :  { %6277 = vmatprep.subr.bf16.mxu0 %v6276_v44 }
 0x66e   :  { %v2554_v40 = vcombine.low %v2529_v35, %v2537_v36  ;;  %v2570_v46 = vcombine.low %v2545_v37, %v2553_v39  ;;  %v2555_v43 = vcombine.high %v2529_v35, %v2537_v36  ;;  %v2571_v52 = vcombine.high %v2545_v37, %v2553_v39  ;;  %6279 = vmatpush3.bf16.msra.mxu0 %v6276_v44  ;;  %v2907_v44 = vld [vmem:[#allocation5 + $0xb8] sm:$0xff] }
 0x670   :  { %v7035_v53 = vrot.slane %v2554_v40, %v6766_v5  ;;  %v7038_v54 = vrot.slane %v2570_v46, %v6766_v5  ;;  %v2569_v55 = vrot.slane %v2555_v43, %v6766_v5  ;;  %v2585_v56 = vrot.slane %v2571_v52, %v6766_v5 }
 0x672   :  { %v2587_v57 = vcombine.high %v7035_v53, %v7038_v54  ;;  %v2586_v59 = vcombine.low %v7035_v53, %v7038_v54  ;;  %v2588_v60 = vcombine.low %v2569_v55, %v2585_v56  ;;  %v2589_v63 = vcombine.high %v2569_v55, %v2585_v56  ;;  %v6444_v54 = vld [vmem:[#allocation8] sm:$0xff] }
 0x673   :  { %v2696_v53 = vsub.s32 6, %v6684_v26 }
 0x674   :  { %2660 = vrot.lane.b32.xlu0 %v2587_v57, %s6571_s17 }
 0x678   :  { %2668 = vrot.lane.b32.xlu0 %v2588_v60, %s6583_s22 }
 0x67c   :  { %2676 = vrot.lane.b32.xlu0 %v2589_v63, %s6584_s23 }
 0x692   :  { %v2163_v1 = vpop.f32.mrb[8].mxu0  ;;  %v2236_v3 = vpop.f32.mrb[18].mxu1 }
 0x693   :  { %v6089_v4 = vpop.f32.mrb[9].mxu0  ;;  %v6094_v6 = vpop.f32.mrb[19].mxu1 }
 0x696   :  { %v2309_v7 = vpop.f32.mrb[10].mxu0  ;;  %v2382_v8 = vpop.f32.mrb[20].mxu1 }
 0x697   :  { %v2454_v9 = vcombine.low %v2163_v1, %v2309_v7  ;;  %v2455_v10 = vcombine.high %v2163_v1, %v2309_v7  ;;  %v2470_v11 = vcombine.low %v2236_v3, %v2382_v8  ;;  %v2471_v47 = vcombine.high %v2236_v3, %v2382_v8  ;;  %v6099_v48 = vpop.f32.mrb[11].mxu0  ;;  %v6104_v41 = vpop.f32.mrb[21].mxu1 }
 0x698   :  { %v6445_v41 = vld [vmem:[#allocation2 + $0x8] sm:$0xff] }
 0x699   :  { %v2462_v51 = vrot.slane %v2454_v9, %v6763_v62  ;;  %v2469_v12 = vrot.slane %v2455_v10, %v6763_v62  ;;  %v2478_v49 = vrot.slane %v2470_v11, %v6763_v62  ;;  %v2485_v22 = vrot.slane %v2471_v47, %v6763_v62 }
 0x69b   :  { %v2486_v42 = vcombine.low %v2462_v51, %v2478_v49  ;;  %v2487_v13 = vcombine.high %v2462_v51, %v2478_v49  ;;  %v2502_v14 = vcombine.low %v2469_v12, %v2485_v22  ;;  %v2503_v61 = vcombine.high %v2469_v12, %v2485_v22  ;;  %v6446_v12 = vld [vmem:[#allocation2] sm:$0xff] }
 0x69d   :  { %v2494_v15 = vrot.slane %v2486_v42, %v6766_v5  ;;  %v2501_v16 = vrot.slane %v2487_v13, %v6766_v5  ;;  %v2510_v18 = vrot.slane %v2502_v14, %v6766_v5  ;;  %v2517_v19 = vrot.slane %v2503_v61, %v6766_v5 }
 0x69f   :  { %v2590_v21 = vcombine.low %v2494_v15, %v2501_v16  ;;  %v5849_v0 = vcombine.high %v2494_v15, %v2501_v16  ;;  %v2606_v23 = vcombine.low %v2510_v18, %v2517_v19  ;;  %v5850_v17 = vcombine.high %v2510_v18, %v2517_v19 }
 0x6a1   :  { %v2597_v2 = vrot.slane %v2590_v21, %v6763_v62  ;;  %v2605_v27 = vrot.slane %v5849_v0, %v6763_v62  ;;  %v2613_v29 = vrot.slane %v2606_v23, %v6763_v62  ;;  %v2621_v45 = vrot.slane %v5850_v17, %v6763_v62  ;;  %v2819_v21 = vld [vmem:[#allocation5 + $0x8] sm:$0xff]  ;;  %v2820_v0 = vld [vmem:[#allocation5 + $0x40] sm:$0xff]  ;;  %v2904_v23 = vld [vmem:[#allocation5 + $0x10] sm:$0xff] }
 0x6a2   :  { %v6280_v17 = vpack.c.bf16 %v2820_v0, %v2819_v21 }
 0x6a3   :  { %v2622_v31 = vcombine.low %v2597_v2, %v2605_v27  ;;  %v2638_v32 = vcombine.low %v2613_v29, %v2621_v45  ;;  %v2623_v33 = vcombine.high %v2597_v2, %v2605_v27  ;;  %v2639_v34 = vcombine.high %v2613_v29, %v2621_v45  ;;  %v2822_v2 = vld [vmem:[#allocation5 + $0xb0] sm:$0xff]  ;;  %v2906_v45 = vld [vmem:[#allocation5 + $0x80] sm:$0xff] }
 0x6a4   :  { %v6288_v27 = vpack.c.bf16 %v2905_v24, %v2904_v23  ;;  %v6284_v29 = vpack.c.bf16 %v2822_v2, %v2821_v25  ;;  %6281 = vmatprep.subr.bf16.mxu1 %v6280_v17 }
 0x6a5   :  { %v2630_v35 = vrot.slane %v2622_v31, %v6766_v5  ;;  %v2646_v36 = vrot.slane %v2638_v32, %v6766_v5  ;;  %v2637_v37 = vrot.slane %v2623_v33, %v6766_v5  ;;  %v2653_v39 = vrot.slane %v2639_v34, %v6766_v5  ;;  %6283 = vmatpush3.bf16.msra.mxu1 %v6280_v17 }
 0x6a6   :  { %6289 = vmatprep.subr.bf16.mxu0 %v6288_v27  ;;  %6285 = vmatprep.subr.bf16.mxu1 %v6284_v29  ;;  %v6292_v31 = vpack.c.bf16 %v2907_v44, %v2906_v45 }
 0x6a7   :  { %v2655_v40 = vcombine.high %v2630_v35, %v2646_v36  ;;  %v2654_v46 = vcombine.low %v2630_v35, %v2646_v36  ;;  %v2656_v43 = vcombine.low %v2637_v37, %v2653_v39  ;;  %v2657_v52 = vcombine.high %v2637_v37, %v2653_v39 }
 0x6a8   :  { %v2809_v39 = vsub.s32 2, %v6684_v26 }
 0x6a9   :  { %2662 = vrot.lane.b32.xlu1 %v2655_v40, %s6571_s17  ;;  %6287 = vmatpush3.bf16.msra.mxu1 %v6284_v29  ;;  %v2815_v40 = vsub.s32 3, %v6684_v26 }
 0x6aa   :  { %6138 = vmatprep.subr.mxu1 %v6578_v50 }
 0x6ad   :  { %2670 = vrot.lane.b32.xlu1 %v2656_v43, %s6583_s22 }
 0x6b1   :  { %2678 = vrot.lane.b32.xlu1 %v2657_v52, %s6584_s23 }
 0x6e6   :  { %v2661_v55 = vpop.permute.xlu0 %2660 }
 0x6e7   :  { %v2682_v57 = vsel %vm1105_vm2, %v2586_v59, %v2661_v55  ;;  %v2697_v59 = vrot.slane %v6444_v54, %v2696_v53  ;;  %v2816_v55 = vrot.slane %v6444_v54, %v2815_v40 }
 0x6ea   :  { %v2669_v56 = vpop.permute.xlu0 %2668 }
 0x6eb   :  { %v2685_v60 = vsel %vm2684_vm3, %v2682_v57, %v2669_v56 }
 0x6ee   :  { %v2677_v63 = vpop.permute.xlu0 %2676 }
 0x6ef   :  { %v2688_v1 = vsel %vm2687_vm4, %v2685_v60, %v2677_v63 }
 0x6f0   :  { %6113 = vmatprep.mubr.msk.f32.mxu0 %vm80_vm0, %v2688_v1 }
 0x71b   :  { %v2663_v3 = vpop.permute.xlu1 %2662 }
 0x71c   :  { %v2683_v6 = vsel %vm1105_vm2, %v2654_v46, %v2663_v3  ;;  %v2810_v46 = vrot.slane %v6444_v54, %v2809_v39 }
 0x71f   :  { %v2671_v4 = vpop.permute.xlu1 %2670 }
 0x720   :  { %v2686_v7 = vsel %vm2684_vm3, %v2683_v6, %v2671_v4 }
 0x723   :  { %v2679_v8 = vpop.permute.xlu1 %2678 }
 0x724   :  { %v2689_v9 = vsel %vm2687_vm4, %v2686_v7, %v2679_v8 }
 0x725   :  { %6114 = vmatmul.mubr.msk.f32.vlgmr.msra.gmra.mrb[12].mxu0 %vm80_vm0, %v2689_v9 }
 0x726   :  { %6291 = vmatpush3.bf16.msra.mxu0 %v6288_v27 }
 0x727   :  { %6293 = vmatprep.subr.bf16.mxu0 %v6292_v31 }
 0x72a   :  { %6295 = vmatpush3.bf16.msra.mxu0 %v6292_v31 }
 0x72b   :  { %6148 = vmatprep.subr.mxu0 %v6578_v50 }
 0x7f8   :  { %v6115_v10 = vpop.f32.mrb[12].mxu0 }
 0x7f9   :  { %v2776_v11 = vadd.f32 %v6115_v10, %v2697_v59  ;;  %v2770_v47 = vpop.f32.mrb[13].mxu0 }
 0x7fa   :  { %v2771_v48 = vadd.f32 %v2770_v47, %v2697_v59 }
 0x7fb   :  { %v7080_v51 = vadd.f32 %v6445_v41, %v2776_v11 }
 0x7fc   :  { %v7082_v49 = vadd.f32 %v6446_v12, %v2771_v48 }
 0x7fd   :  { %v2784_v22 = vsel %vm80_vm0, %v7080_v51, 0.0 }
 0x7fe   :  { %2785 = vadd.xlane.f32.xlu1 %v2784_v22  ;;  %v2781_v42 = vsel %vm80_vm0, %v7082_v49, 0.0 }
 0x7ff   :  { %2782 = vadd.xlane.f32.xlu0 %v2781_v42 }
 0x88b   :  { %v2786_v13 = vpop.xlane.xlu1 %2785 }
 0x88c   :  { %v2788_v14 = vmul.f32 0.03125, %v2786_v13  ;;  %v2783_v61 = vpop.xlane.xlu0 %2782 }
 0x88d   :  { %v2787_v58 = vmul.f32 0.03125, %v2783_v61 }
 0x88e   :  { %v2790_v38 = vsub.f32 %v7080_v51, %v2788_v14 }
 0x88f   :  { %v2789_v15 = vsub.f32 %v7082_v49, %v2787_v58 }
 0x890   :  { %v2792_v19 = vmul.f32 %v2790_v38, %v2790_v38 }
 0x891   :  { %v2791_v16 = vmul.f32 %v2789_v15, %v2789_v15 }
 0x892   :  { %v2796_v20 = vsel %vm80_vm0, %v2792_v19, 0.0 }
 0x893   :  { %v2793_v18 = vsel %vm80_vm0, %v2791_v16, 0.0 }
 0x894   :  { %2794 = vadd.xlane.f32.xlu0 %v2793_v18 }
 0x898   :  { %2797 = vadd.xlane.f32.xlu0 %v2796_v20 }
 0x921   :  { %v2795_v32 = vpop.xlane.xlu0 %2794 }
 0x922   :  { %v2799_v33 = vmul.f32 0.03125, %v2795_v32 }
 0x924   :  { %v2801_v34 = vadd.f32 1e-05, %v2799_v33 }
 0x925   :  { %v2798_v35 = vpop.xlane.xlu0 %2797 }
 0x926   :  { %6400 = vrsqrt.f32 %v2801_v34  ;;  %v2800_v36 = vmul.f32 0.03125, %v2798_v35 }
 0x928   :  { %v2802_v37 = vadd.f32 1e-05, %v2800_v36 }
 0x92a   :  { %6402 = vrsqrt.f32 %v2802_v37 }
 0x930   :  { %v6401_v43 = vpop.eup %6400 }
 0x931   :  { %v2805_v52 = vmul.f32 %v6401_v43, %v2789_v15 }
 0x933   :  { %v2811_v56 = vmul.f32 %v2810_v46, %v2805_v52 }
 0x934   :  { %v6403_v57 = vpop.eup %6402 }
 0x935   :  { %v2806_v60 = vmul.f32 %v6403_v57, %v2790_v38  ;;  %v2817_v63 = vadd.f32 %v2816_v55, %v2811_v56 }
 0x937   :  { %v2812_v1 = vmul.f32 %v2810_v46, %v2806_v60  ;;  %6124 = vmatprep.mubr.msk.f32.mxu1 %vm80_vm0, %v2817_v63  ;;  %6135 = vmatprep.mubr.msk.f32.mxu0 %vm80_vm0, %v2817_v63 }
 0x939   :  { %v2818_v3 = vadd.f32 %v2816_v55, %v2812_v1 }
 0x93b   :  { %6125 = vmatmul.mubr.msk.f32.vlgmr.msra.gmra.mrb[22].mxu1 %vm80_vm0, %v2818_v3  ;;  %6136 = vmatmul.mubr.msk.f32.vlgmr.msra.gmra.mrb[14].mxu0 %vm80_vm0, %v2818_v3 }
 0x93c   :  { %6140 = vmatprep.mubr.msk.f32.mxu1 %vm6579_vm1, %v6578_v50  ;;  %6150 = vmatprep.mubr.msk.f32.mxu0 %vm6579_vm1, %v6578_v50 }
 0xa0e   :  { %v6126_v4 = vpop.f32.mrb[22].mxu1  ;;  %v7104_v6 = vpop.f32.mrb[14].mxu0 }
 0xa0f   :  { %v2895_v7 = vpop.f32.mrb[23].mxu1  ;;  %v7106_v8 = vpop.f32.mrb[15].mxu0  ;;  %v7121_v53 = vmul.f32 0.35355338, %v6126_v4 }
 0xa10   :  { %3285 = vrot.lane.b32.xlu1 %v7106_v8, %s6574_s3  ;;  %3279 = vrot.lane.b32.xlu0 %v7106_v8, %s6575_s18  ;;  %v2983_v9 = vmul.f32 0.35355338, %v2895_v7 }
 0xa14   :  { %3291 = vrot.lane.b32.xlu1 %v7106_v8, %s6576_s19  ;;  %2993 = vrot.lane.b32.xlu0 %v2983_v9, %s6574_s3 }
 0xa18   :  { %3281 = vrot.lane.b32.xlu0 %v7104_v6, %s6575_s18  ;;  %2987 = vrot.lane.b32.xlu1 %v2983_v9, %s6575_s18 }
 0xa1c   :  { %3293 = vrot.lane.b32.xlu0 %v7104_v6, %s6576_s19  ;;  %2999 = vrot.lane.b32.xlu1 %v2983_v9, %s6576_s19 }
 0xa20   :  { %2995 = vrot.lane.b32.xlu0 %v7121_v53, %s6574_s3  ;;  %3287 = vrot.lane.b32.xlu1 %v7104_v6, %s6574_s3 }
 0xa24   :  { %2989 = vrot.lane.b32.xlu1 %v7121_v53, %s6575_s18 }
 0xa28   :  { %3001 = vrot.lane.b32.xlu1 %v7121_v53, %s6576_s19 }
 0xa82   :  { %v7131_v54 = vpop.permute.xlu1 %3285  ;;  %v7133_v59 = vpop.permute.xlu0 %3279 }
 0xa83   :  { %v3297_v10 = vcombine.low %v7106_v8, %v7131_v54  ;;  %v3298_v11 = vcombine.high %v7106_v8, %v7131_v54 }
 0xa85   :  { %v3305_v22 = vrot.slane %v3297_v10, %v6763_v62  ;;  %v3312_v42 = vrot.slane %v3298_v11, %v6763_v62 }
 0xa86   :  { %v7139_v47 = vpop.permute.xlu1 %3291  ;;  %v2994_v48 = vpop.permute.xlu0 %2993 }
 0xa87   :  { %v3313_v41 = vcombine.low %v7133_v59, %v7139_v47  ;;  %v3314_v12 = vcombine.high %v7133_v59, %v7139_v47  ;;  %v3005_v23 = vcombine.low %v2983_v9, %v2994_v48  ;;  %v3006_v17 = vcombine.high %v2983_v9, %v2994_v48 }
 0xa89   :  { %v3321_v13 = vrot.slane %v3313_v41, %v6763_v62  ;;  %v3328_v14 = vrot.slane %v3314_v12, %v6763_v62  ;;  %v3013_v39 = vrot.slane %v3005_v23, %v6763_v62  ;;  %v3020_v40 = vrot.slane %v3006_v17, %v6763_v62 }
 0xa8a   :  { %v7149_v61 = vpop.permute.xlu0 %3281  ;;  %v2988_v58 = vpop.permute.xlu1 %2987 }
 0xa8b   :  { %v3329_v38 = vcombine.low %v3305_v22, %v3321_v13  ;;  %v3330_v15 = vcombine.high %v3305_v22, %v3321_v13  ;;  %v3345_v16 = vcombine.low %v3312_v42, %v3328_v14  ;;  %v3346_v18 = vcombine.high %v3312_v42, %v3328_v14 }
 0xa8d   :  { %v3337_v19 = vrot.slane %v3329_v38, %v6766_v5  ;;  %v3344_v20 = vrot.slane %v3330_v15, %v6766_v5  ;;  %v3353_v21 = vrot.slane %v3345_v16, %v6766_v5  ;;  %v3360_v0 = vrot.slane %v3346_v18, %v6766_v5 }
 0xa8e   :  { %v7155_v24 = vpop.permute.xlu0 %3293  ;;  %v3000_v25 = vpop.permute.xlu1 %2999 }
 0xa8f   :  { %v3433_v2 = vcombine.low %v3337_v19, %v3344_v20  ;;  %v5861_v27 = vcombine.high %v3337_v19, %v3344_v20  ;;  %v3449_v29 = vcombine.low %v3353_v21, %v3360_v0  ;;  %v5862_v45 = vcombine.high %v3353_v21, %v3360_v0 }
 0xa90   :  { %v3381_v44 = vcombine.low %v7149_v61, %v7155_v24  ;;  %v3382_v31 = vcombine.high %v7149_v61, %v7155_v24  ;;  %v3021_v32 = vcombine.low %v2988_v58, %v3000_v25  ;;  %v3022_v33 = vcombine.high %v2988_v58, %v3000_v25 }
 0xa91   :  { %v3440_v34 = vrot.slane %v3433_v2, %v6763_v62  ;;  %v3448_v35 = vrot.slane %v5861_v27, %v6763_v62  ;;  %v3456_v36 = vrot.slane %v3449_v29, %v6763_v62  ;;  %v3464_v37 = vrot.slane %v5862_v45, %v6763_v62 }
 0xa92   :  { %v3029_v46 = vrot.slane %v3021_v32, %v6763_v62  ;;  %v3036_v43 = vrot.slane %v3022_v33, %v6763_v62  ;;  %v7169_v52 = vpop.permute.xlu1 %3287  ;;  %v3389_v57 = vrot.slane %v3381_v44, %v6763_v62  ;;  %v3396_v60 = vrot.slane %v3382_v31, %v6763_v62  ;;  %v2996_v7 = vpop.permute.xlu0 %2995 }
 0xa93   :  { %v3465_v55 = vcombine.low %v3440_v34, %v3448_v35  ;;  %v3466_v56 = vcombine.high %v3440_v34, %v3448_v35  ;;  %v3481_v9 = vcombine.low %v3456_v36, %v3464_v37  ;;  %v3482_v10 = vcombine.high %v3456_v36, %v3464_v37 }
 0xa94   :  { %v3037_v63 = vcombine.low %v3013_v39, %v3029_v46  ;;  %v3038_v1 = vcombine.high %v3013_v39, %v3029_v46  ;;  %v3053_v3 = vcombine.low %v3020_v40, %v3036_v43  ;;  %v3054_v4 = vcombine.high %v3020_v40, %v3036_v43 }
 0xa95   :  { %v3365_v11 = vcombine.low %v7104_v6, %v7169_v52  ;;  %v3366_v48 = vcombine.high %v7104_v6, %v7169_v52  ;;  %v3073_v13 = vcombine.low %v7121_v53, %v2996_v7  ;;  %v3074_v14 = vcombine.high %v7121_v53, %v2996_v7 }
 0xa96   :  { %v3045_v41 = vrot.slane %v3037_v63, %v6766_v5  ;;  %v3052_v12 = vrot.slane %v3038_v1, %v6766_v5  ;;  %v3061_v22 = vrot.slane %v3053_v3, %v6766_v5  ;;  %v3068_v42 = vrot.slane %v3054_v4, %v6766_v5  ;;  %v2990_v15 = vpop.permute.xlu1 %2989 }
 0xa97   :  { %v3373_v58 = vrot.slane %v3365_v11, %v6763_v62  ;;  %v3380_v38 = vrot.slane %v3366_v48, %v6763_v62  ;;  %v3473_v43 = vrot.slane %v3465_v55, %v6766_v5  ;;  %v3496_v63 = vrot.slane %v3482_v10, %v6766_v5 }
 0xa98   :  { %v3141_v16 = vcombine.low %v3045_v41, %v3052_v12  ;;  %v5857_v18 = vcombine.high %v3045_v41, %v3052_v12  ;;  %v3157_v19 = vcombine.low %v3061_v22, %v3068_v42  ;;  %v5858_v20 = vcombine.high %v3061_v22, %v3068_v42 }
 0xa99   :  { %v3397_v21 = vcombine.low %v3373_v58, %v3389_v57  ;;  %v3398_v0 = vcombine.high %v3373_v58, %v3389_v57  ;;  %v3413_v23 = vcombine.low %v3380_v38, %v3396_v60  ;;  %v3414_v17 = vcombine.high %v3380_v38, %v3396_v60 }
 0xa9a   :  { %v3148_v25 = vrot.slane %v3141_v16, %v6763_v62  ;;  %v3156_v2 = vrot.slane %v5857_v18, %v6763_v62  ;;  %v3164_v27 = vrot.slane %v3157_v19, %v6763_v62  ;;  %v3172_v53 = vrot.slane %v5858_v20, %v6763_v62  ;;  %v3002_v46 = vpop.permute.xlu1 %3001 }
 0xa9b   :  { %v3405_v29 = vrot.slane %v3397_v21, %v6766_v5  ;;  %v3412_v45 = vrot.slane %v3398_v0, %v6766_v5  ;;  %v3421_v44 = vrot.slane %v3413_v23, %v6766_v5  ;;  %v3428_v31 = vrot.slane %v3414_v17, %v6766_v5 }
 0xa9c   :  { %v3173_v32 = vcombine.low %v3148_v25, %v3156_v2  ;;  %v3174_v33 = vcombine.high %v3148_v25, %v3156_v2  ;;  %v3189_v34 = vcombine.low %v3164_v27, %v3172_v53  ;;  %v3190_v35 = vcombine.high %v3164_v27, %v3172_v53 }
 0xa9d   :  { %v3501_v36 = vcombine.low %v3405_v29, %v3412_v45  ;;  %v5863_v37 = vcombine.high %v3405_v29, %v3412_v45  ;;  %v3517_v39 = vcombine.low %v3421_v44, %v3428_v31  ;;  %v5864_v40 = vcombine.high %v3421_v44, %v3428_v31 }
 0xa9e   :  { %v3489_v57 = vrot.slane %v3481_v9, %v6766_v5  ;;  %v7196_v60 = vrot.slane %v3466_v56, %v6766_v5  ;;  %v3089_v11 = vcombine.low %v2990_v15, %v3002_v46  ;;  %v3090_v56 = vcombine.high %v2990_v15, %v3002_v46 }
 0xa9f   :  { %v7200_v1 = vrot.slane %v3501_v36, %v6763_v62  ;;  %v7203_v3 = vrot.slane %v5863_v37, %v6763_v62  ;;  %v7206_v4 = vrot.slane %v3517_v39, %v6763_v62  ;;  %v7209_v7 = vrot.slane %v5864_v40, %v6763_v62 }
 0xaa0   :  { %v3497_v55 = vcombine.low %v3473_v43, %v3489_v57  ;;  %v3499_v9 = vcombine.low %v7196_v60, %v3496_v63  ;;  %v3081_v48 = vrot.slane %v3073_v13, %v6763_v62  ;;  %v3088_v10 = vrot.slane %v3074_v14, %v6763_v62 }
 0xaa1   :  { %v3533_v41 = vcombine.low %v7200_v1, %v7203_v3  ;;  %v3097_v12 = vrot.slane %v3089_v11, %v6763_v62  ;;  %v3104_v22 = vrot.slane %v3090_v56, %v6763_v62  ;;  %v3181_v42 = vrot.slane %v3173_v32, %v6766_v5 }
 0xaa2   :  { %6139 = vmatpush3.xpose.msk.msra.mxu1 %vm1105_vm2, %v3497_v55  ;;  %6149 = vmatpush3.xpose.msk.msra.mxu0 %vm1105_vm2, %v3499_v9  ;;  %v3549_v58 = vcombine.low %v7206_v4, %v7209_v7  ;;  %v3197_v13 = vrot.slane %v3189_v34, %v6766_v5  ;;  %v3188_v14 = vrot.slane %v3174_v33, %v6766_v5 }
 0xaa3   :  { %6143 = vmatprep.subr.mxu1 %v6578_v50  ;;  %v3204_v38 = vrot.slane %v3190_v35, %v6766_v5  ;;  %v3105_v15 = vcombine.low %v3081_v48, %v3097_v12  ;;  %v3106_v16 = vcombine.high %v3081_v48, %v3097_v12  ;;  %v3121_v18 = vcombine.low %v3088_v10, %v3104_v22 }
 0xaa4   :  { %v3122_v19 = vcombine.high %v3088_v10, %v3104_v22  ;;  %6158 = vmatprep.subr.mxu0 %v6578_v50  ;;  %v3534_v20 = vcombine.high %v7200_v1, %v7203_v3  ;;  %v3205_v21 = vcombine.low %v3181_v42, %v3197_v13  ;;  %v3498_v0 = vcombine.high %v3473_v43, %v3489_v57 }
 0xaa5   :  { %v3207_v23 = vcombine.low %v3188_v14, %v3204_v38  ;;  %v3113_v17 = vrot.slane %v3105_v15, %v6766_v5  ;;  %v3120_v25 = vrot.slane %v3106_v16, %v6766_v5  ;;  %v3129_v2 = vrot.slane %v3121_v18, %v6766_v5 }
 0xaa6   :  { %v3136_v27 = vrot.slane %v3122_v19, %v6766_v5  ;;  %v3550_v53 = vcombine.high %v7206_v4, %v7209_v7  ;;  %6141 = vmatmul.mubr.msk.f32.vlgmr.msra.gmra.mrb[24].mxu1 %vm1105_vm2, %v3205_v21  ;;  %v3541_v29 = vrot.slane %v3533_v41, %v6766_v5  ;;  %v3557_v45 = vrot.slane %v3549_v58, %v6766_v5 }
 0xaa7   :  { %6151 = vmatmul.mubr.msk.f32.vlgmr.msra.gmra.mrb[16].mxu0 %vm1105_vm2, %v3207_v23  ;;  %v3209_v44 = vcombine.low %v3113_v17, %v3120_v25  ;;  %v5859_v31 = vcombine.high %v3113_v17, %v3120_v25  ;;  %6144 = vmatpush3.xpose.msk.msra.mxu1 %vm1105_vm2, %v3498_v0  ;;  %v3206_v34 = vcombine.high %v3181_v42, %v3197_v13 }
 0xaa8   :  { %v3225_v32 = vcombine.low %v3129_v2, %v3136_v27  ;;  %v5860_v33 = vcombine.high %v3129_v2, %v3136_v27  ;;  %6145 = vmatprep.mubr.msk.f32.mxu1 %vm6579_vm1, %v6578_v50  ;;  %6153 = vmatprep.subr.mxu1 %v6578_v50  ;;  %v3500_v35 = vcombine.high %v7196_v60, %v3496_v63 }
 0xaa9   :  { %v3565_v36 = vcombine.low %v3541_v29, %v3557_v45  ;;  %v3216_v37 = vrot.slane %v3209_v44, %v6763_v62  ;;  %v3224_v39 = vrot.slane %v5859_v31, %v6763_v62  ;;  %6160 = vmatprep.mubr.msk.f32.mxu0 %vm6579_vm1, %v6578_v50  ;;  %v3208_v63 = vcombine.high %v3188_v14, %v3204_v38 }
 0xaaa   :  { %v3232_v40 = vrot.slane %v3225_v32, %v6763_v62  ;;  %v3240_v46 = vrot.slane %v5860_v33, %v6763_v62  ;;  %6146 = vmatmul.mubr.msk.f32.vlgmr.msra.gmra.mrb[26].mxu1 %vm1105_vm2, %v3206_v34  ;;  %v3548_v3 = vrot.slane %v3534_v20, %v6766_v5  ;;  %v3564_v4 = vrot.slane %v3550_v53, %v6766_v5 }
 0xaab   :  { %6159 = vmatpush3.xpose.msk.msra.mxu0 %vm1105_vm2, %v3565_v36  ;;  %v3241_v43 = vcombine.low %v3216_v37, %v3224_v39  ;;  %v3242_v57 = vcombine.high %v3216_v37, %v3224_v39  ;;  %6154 = vmatpush3.xpose.msk.msra.mxu1 %vm1105_vm2, %v3500_v35  ;;  %v3566_v7 = vcombine.high %v3541_v29, %v3557_v45 }
 0xaac   :  { %v3257_v1 = vcombine.low %v3232_v40, %v3240_v46  ;;  %v3258_v60 = vcombine.high %v3232_v40, %v3240_v46  ;;  %6155 = vmatprep.mubr.msk.f32.mxu1 %vm6579_vm1, %v6578_v50  ;;  %6163 = vmatprep.subr.mxu1 %v6578_v50  ;;  %v3567_v41 = vcombine.low %v3548_v3, %v3564_v4 }
 0xaad   :  { %6168 = vmatprep.subr.mxu0 %v6578_v50  ;;  %v3249_v55 = vrot.slane %v3241_v43, %v6766_v5  ;;  %v3256_v11 = vrot.slane %v3242_v57, %v6766_v5  ;;  %v3568_v12 = vcombine.high %v3548_v3, %v3564_v4 }
 0xaae   :  { %v3265_v9 = vrot.slane %v3257_v1, %v6766_v5  ;;  %6156 = vmatmul.mubr.msk.f32.vlgmr.msra.gmra.mrb[28].mxu1 %vm1105_vm2, %v3208_v63  ;;  %v3272_v10 = vrot.slane %v3258_v60, %v6766_v5 }
 0xaaf   :  { %6164 = vmatpush3.xpose.msk.msra.mxu1 %vm1105_vm2, %v3566_v7  ;;  %6165 = vmatprep.mubr.msk.f32.mxu1 %vm6579_vm1, %v6578_v50 }
 0xab0   :  { %v3273_v56 = vcombine.low %v3249_v55, %v3265_v9  ;;  %v3274_v48 = vcombine.high %v3249_v55, %v3265_v9  ;;  %6173 = vmatprep.subr.mxu1 %v6578_v50  ;;  %v3275_v22 = vcombine.low %v3256_v11, %v3272_v10  ;;  %v3276_v42 = vcombine.high %v3256_v11, %v3272_v10 }
 0xab2   :  { %6161 = vmatmul.mubr.msk.f32.vlgmr.msra.gmra.mrb[18].mxu0 %vm1105_vm2, %v3273_v56  ;;  %6166 = vmatmul.mubr.msk.f32.vlgmr.msra.gmra.mrb[30].mxu1 %vm1105_vm2, %v3274_v48 }
 0xab3   :  { %6169 = vmatpush3.xpose.msk.msra.mxu0 %vm1105_vm2, %v3567_v41  ;;  %6174 = vmatpush3.xpose.msk.msra.mxu1 %vm1105_vm2, %v3568_v12 }
 0xab4   :  { %6170 = vmatprep.mubr.msk.f32.mxu0 %vm6579_vm1, %v6578_v50  ;;  %6175 = vmatprep.mubr.msk.f32.mxu1 %vm6579_vm1, %v6578_v50 }
 0xab5   :  { %6178 = vmatprep.subr.mxu0 %v6578_v50  ;;  %6183 = vmatprep.subr.mxu1 %v6578_v50 }
 0xab6   :  { %6171 = vmatmul.mubr.msk.f32.vlgmr.msra.gmra.mrb[20].mxu0 %vm1105_vm2, %v3275_v22  ;;  %6176 = vmatmul.mubr.msk.f32.vlgmr.msra.gmra.mrb[32].mxu1 %vm1105_vm2, %v3276_v42 }
 0xab7   :  { %6180 = vmatprep.mubr.msk.f32.mxu0 %vm6579_vm1, %v6578_v50  ;;  %6185 = vmatprep.mubr.msk.f32.mxu1 %vm6579_vm1, %v6578_v50 }
 0xb79   :  { %v3937_v58 = vpop.f32.mrb[24].mxu1 }
 0xb7a   :  { %v4089_v13 = vpop.f32.mrb[16].mxu0  ;;  %v6142_v14 = vpop.f32.mrb[25].mxu1  ;;  %v4473_v15 = vsel %vm1105_vm2, %v3937_v58, -inf }
 0xb7b   :  { %v6152_v38 = vpop.f32.mrb[17].mxu0  ;;  %4474 = vmax.xlane.f32.xlu0 %v4473_v15  ;;  %v4479_v19 = vsel %vm1105_vm2, %v4089_v13, -inf }
 0xb7d   :  { %v4013_v16 = vpop.f32.mrb[26].mxu1 }
 0xb7e   :  { %v6147_v18 = vpop.f32.mrb[27].mxu1  ;;  %v4476_v20 = vsel %vm1105_vm2, %v4013_v16, -inf }
 0xb7f   :  { %4480 = vmax.xlane.f32.xlu0 %v4479_v19  ;;  %4477 = vmax.xlane.f32.xlu1 %v4476_v20 }
 0xb81   :  { %v4165_v21 = vpop.f32.mrb[28].mxu1 }
 0xb82   :  { %v6157_v0 = vpop.f32.mrb[29].mxu1  ;;  %v4482_v44 = vsel %vm1105_vm2, %v4165_v21, -inf }
 0xb85   :  { %v4241_v23 = vpop.f32.mrb[18].mxu0  ;;  %v7288_v17 = vpop.f32.mrb[30].mxu1 }
 0xb86   :  { %v6162_v25 = vpop.f32.mrb[19].mxu0  ;;  %v4485_v2 = vsel %vm1105_vm2, %v4241_v23, -inf  ;;  %v6167_v27 = vpop.f32.mrb[31].mxu1  ;;  %v4488_v33 = vsel %vm1105_vm2, %v7288_v17, -inf }
 0xb87   :  { %4486 = vmax.xlane.f32.xlu0 %v4485_v2 }
 0xb89   :  { %v4393_v53 = vpop.f32.mrb[20].mxu0  ;;  %v7291_v29 = vpop.f32.mrb[32].mxu1 }
 0xb8a   :  { %v6172_v45 = vpop.f32.mrb[21].mxu0  ;;  %v6177_v31 = vpop.f32.mrb[33].mxu1  ;;  %v4491_v32 = vsel %vm1105_vm2, %v4393_v53, -inf  ;;  %v4494_v34 = vsel %vm1105_vm2, %v7291_v29, -inf }
 0xb8b   :  { %4483 = vmax.xlane.f32.xlu0 %v4482_v44 }
 0xb8f   :  { %4492 = vmax.xlane.f32.xlu0 %v4491_v32 }
 0xb90   :  { %3573 = vrot.lane.b32.xlu1 %v7133_v59, %s6577_s20 }
 0xb94   :  { %3577 = vrot.lane.b32.xlu1 %v7131_v54, %s6577_s20 }
 0xba5   :  { %3569 = vrot.lane.b32.xlu0 %v7106_v8, %s6577_s20 }
 0xbb8   :  { %4489 = vmax.xlane.f32.xlu1 %v4488_v33 }
 0xbbc   :  { %4495 = vmax.xlane.f32.xlu1 %v4494_v34 }
 0xbcd   :  { %3581 = vrot.lane.b32.xlu1 %v7139_v47, %s6577_s20 }
 0xc08   :  { %v4475_v35 = vpop.xlane.xlu0 %4474 }
 0xc09   :  { %v4497_v36 = vsub.f32 %v3937_v58, %v4475_v35 }
 0xc0b   :  { %v4505_v59 = vmul.f32 1.442695, %v4497_v36 }
 0xc0c   :  { %v4481_v37 = vpop.xlane.xlu0 %4480  ;;  %v4478_v39 = vpop.xlane.xlu1 %4477 }
 0xc0d   :  { %6404 = vpow2.f32 %v4505_v59  ;;  %v4499_v54 = vsub.f32 %v4089_v13, %v4481_v37  ;;  %v4498_v40 = vsub.f32 %v4013_v16, %v4478_v39 }
 0xc0f   :  { %v4509_v8 = vmul.f32 1.442695, %v4499_v54  ;;  %v4507_v46 = vmul.f32 1.442695, %v4498_v40 }
 0xc10   :  { %v3574_v14 = vpop.permute.xlu1 %3573 }
 0xc11   :  { %6406 = vpow2.f32 %v4509_v8 }
 0xc12   :  { %6408 = vpow2.f32 %v4507_v46 }
 0xc14   :  { %v4487_v43 = vpop.xlane.xlu0 %4486  ;;  %v3578_v38 = vpop.permute.xlu1 %3577 }
 0xc15   :  { %v4501_v57 = vsub.f32 %v4241_v23, %v4487_v43 }
 0xc17   :  { %v4513_v1 = vmul.f32 1.442695, %v4501_v57  ;;  %v7307_v60 = vpop.eup %6404 }
 0xc18   :  { %v4484_v63 = vpop.xlane.xlu0 %4483  ;;  %v4521_v3 = vsel %vm1105_vm2, %v7307_v60, 0.0 }
 0xc19   :  { %6410 = vpow2.f32 %v4513_v1  ;;  %v4500_v47 = vsub.f32 %v4165_v21, %v4484_v63  ;;  %4522 = vadd.xlane.f32.xlu0 %v4521_v3 }
 0xc1b   :  { %v4511_v4 = vmul.f32 1.442695, %v4500_v47  ;;  %v7311_v7 = vpop.eup %6406 }
 0xc1c   :  { %v4493_v55 = vpop.xlane.xlu0 %4492  ;;  %v7313_v9 = vpop.eup %6408  ;;  %v4527_v56 = vsel %vm1105_vm2, %v7311_v7, 0.0 }
 0xc1d   :  { %6412 = vpow2.f32 %v4511_v4  ;;  %v4503_v11 = vsub.f32 %v4393_v53, %v4493_v55  ;;  %4528 = vadd.xlane.f32.xlu0 %v4527_v56  ;;  %v4524_v48 = vsel %vm1105_vm2, %v7313_v9, 0.0 }
 0xc1e   :  { %4525 = vadd.xlane.f32.xlu1 %v4524_v48 }
 0xc1f   :  { %v4517_v10 = vmul.f32 1.442695, %v4503_v11 }
 0xc20   :  { %v3570_v19 = vpop.permute.xlu0 %3569 }
 0xc21   :  { %6414 = vpow2.f32 %v4517_v10  ;;  %v3593_v0 = vcombine.low %v3570_v19, %v3578_v38  ;;  %v3594_v23 = vcombine.high %v3570_v19, %v3578_v38 }
 0xc23   :  { %v7319_v41 = vpop.eup %6410  ;;  %v3601_v45 = vrot.slane %v3593_v0, %v6763_v62  ;;  %v3608_v44 = vrot.slane %v3594_v23, %v6763_v62 }
 0xc24   :  { %v4533_v12 = vsel %vm1105_vm2, %v7319_v41, 0.0 }
 0xc25   :  { %4534 = vadd.xlane.f32.xlu0 %v4533_v12 }
 0xc27   :  { %v7323_v22 = vpop.eup %6412 }
 0xc28   :  { %v4530_v42 = vsel %vm1105_vm2, %v7323_v22, 0.0 }
 0xc29   :  { %4531 = vadd.xlane.f32.xlu1 %v4530_v42 }
 0xc2b   :  { %v7327_v58 = vpop.eup %6414 }
 0xc2c   :  { %v4539_v13 = vsel %vm1105_vm2, %v7327_v58, 0.0 }
 0xc2d   :  { %4540 = vadd.xlane.f32.xlu0 %v4539_v13 }
 0xc45   :  { %v4490_v15 = vpop.xlane.xlu1 %4489 }
 0xc46   :  { %v4502_v16 = vsub.f32 %v7288_v17, %v4490_v15 }
 0xc48   :  { %v4515_v18 = vmul.f32 1.442695, %v4502_v16 }
 0xc49   :  { %v4496_v20 = vpop.xlane.xlu1 %4495 }
 0xc4a   :  { %6416 = vpow2.f32 %v4515_v18  ;;  %v4504_v21 = vsub.f32 %v7291_v29, %v4496_v20 }
 0xc4c   :  { %v4519_v25 = vmul.f32 1.442695, %v4504_v21 }
 0xc4d   :  { %v3582_v2 = vpop.permute.xlu1 %3581 }
 0xc4e   :  { %6418 = vpow2.f32 %v4519_v25  ;;  %v3609_v27 = vcombine.low %v3574_v14, %v3582_v2  ;;  %v3610_v53 = vcombine.high %v3574_v14, %v3582_v2 }
 0xc50   :  { %v3617_v31 = vrot.slane %v3609_v27, %v6763_v62  ;;  %v3624_v17 = vrot.slane %v3610_v53, %v6763_v62 }
 0xc52   :  { %v3625_v32 = vcombine.low %v3601_v45, %v3617_v31  ;;  %v3626_v33 = vcombine.high %v3601_v45, %v3617_v31  ;;  %v3641_v34 = vcombine.low %v3608_v44, %v3624_v17  ;;  %v3642_v35 = vcombine.high %v3608_v44, %v3624_v17 }
 0xc54   :  { %v7337_v29 = vpop.eup %6416  ;;  %v3633_v36 = vrot.slane %v3625_v32, %v6766_v5  ;;  %v3640_v59 = vrot.slane %v3626_v33, %v6766_v5  ;;  %v3649_v37 = vrot.slane %v3641_v34, %v6766_v5  ;;  %v3656_v39 = vrot.slane %v3642_v35, %v6766_v5 }
 0xc55   :  { %v4536_v54 = vsel %vm1105_vm2, %v7337_v29, 0.0 }
 0xc56   :  { %v3729_v40 = vcombine.low %v3633_v36, %v3640_v59  ;;  %v5865_v8 = vcombine.high %v3633_v36, %v3640_v59  ;;  %v3745_v46 = vcombine.low %v3649_v37, %v3656_v39  ;;  %v5866_v43 = vcombine.high %v3649_v37, %v3656_v39  ;;  %4537 = vadd.xlane.f32.xlu1 %v4536_v54 }
 0xc58   :  { %v7345_v57 = vpop.eup %6418  ;;  %v3736_v1 = vrot.slane %v3729_v40, %v6763_v62  ;;  %v3744_v63 = vrot.slane %v5865_v8, %v6763_v62  ;;  %v3752_v47 = vrot.slane %v3745_v46, %v6763_v62  ;;  %v3760_v3 = vrot.slane %v5866_v43, %v6763_v62 }
 0xc59   :  { %v4542_v4 = vsel %vm1105_vm2, %v7345_v57, 0.0 }
 0xc5a   :  { %4543 = vadd.xlane.f32.xlu0 %v4542_v4  ;;  %v3761_v55 = vcombine.low %v3736_v1, %v3744_v63  ;;  %v3777_v11 = vcombine.low %v3752_v47, %v3760_v3  ;;  %v3762_v56 = vcombine.high %v3736_v1, %v3744_v63  ;;  %v3778_v48 = vcombine.high %v3752_v47, %v3760_v3 }
 0xc5c   :  { %v3769_v10 = vrot.slane %v3761_v55, %v6766_v5  ;;  %v3785_v12 = vrot.slane %v3777_v11, %v6766_v5  ;;  %v3776_v42 = vrot.slane %v3762_v56, %v6766_v5  ;;  %v3792_v13 = vrot.slane %v3778_v48, %v6766_v5 }
 0xc5e   :  { %v3793_v14 = vcombine.low %v3769_v10, %v3785_v12  ;;  %v3794_v38 = vcombine.high %v3769_v10, %v3785_v12  ;;  %v3795_v15 = vcombine.low %v3776_v42, %v3792_v13  ;;  %v3796_v16 = vcombine.high %v3776_v42, %v3792_v13 }
 0xc60   :  { %6179 = vmatpush3.msra.mxu0 %v3793_v14  ;;  %6184 = vmatpush3.msra.mxu1 %v3794_v38 }
 0xc61   :  { %6188 = vmatprep.subr.mxu0 %v6578_v50  ;;  %6193 = vmatprep.subr.mxu1 %v6578_v50 }
 0xc67   :  { %3575 = vrot.lane.b32.xlu1 %v7149_v61, %s6577_s20 }
 0xc6b   :  { %3579 = vrot.lane.b32.xlu1 %v7169_v52, %s6577_s20 }
 0xc6f   :  { %3583 = vrot.lane.b32.xlu1 %v7155_v24, %s6577_s20 }
 0xc70   :  { %3571 = vrot.lane.b32.xlu0 %v7104_v6, %s6577_s20 }
 0xca6   :  { %v4523_v18 = vpop.xlane.xlu0 %4522 }
 0xca7   :  { %6420 = vrcp.f32 %v4523_v18 }
 0xcaa   :  { %v4529_v19 = vpop.xlane.xlu0 %4528 }
 0xcab   :  { %6422 = vrcp.f32 %v4529_v19  ;;  %v4526_v20 = vpop.xlane.xlu1 %4525 }
 0xcac   :  { %6424 = vrcp.f32 %v4526_v20 }
 0xcb1   :  { %v6421_v21 = vpop.eup %6420 }
 0xcb2   :  { %v4553_v0 = vmul.f32 %v6421_v21, %v7307_v60 }
 0xcb4   :  { %6181 = vmatmul.mubr.msk.f32.vlgmr.msra.gmra.mrb[22].mxu0 %vm1105_vm2, %v4553_v0 }
 0xcb5   :  { %v6423_v61 = vpop.eup %6422  ;;  %6189 = vmatpush3.msra.mxu0 %v3795_v15  ;;  %6190 = vmatprep.mubr.msk.f32.mxu0 %vm6579_vm1, %v6578_v50 }
 0xcb6   :  { %v4532_v52 = vpop.xlane.xlu1 %4531  ;;  %v6425_v24 = vpop.eup %6424  ;;  %v4555_v6 = vmul.f32 %v6423_v61, %v7311_v7  ;;  %6198 = vmatprep.subr.mxu0 %v6578_v50 }
 0xcb7   :  { %6426 = vrcp.f32 %v4532_v52  ;;  %v4554_v23 = vmul.f32 %v6425_v24, %v7313_v9  ;;  %v4535_v9 = vpop.xlane.xlu0 %4534 }
 0xcb8   :  { %6191 = vmatmul.mubr.msk.f32.vlgmr.msra.gmra.mrb[24].mxu0 %vm1105_vm2, %v4555_v6  ;;  %6428 = vrcp.f32 %v4535_v9 }
 0xcb9   :  { %6186 = vmatmul.mubr.msk.f32.vlgmr.msra.gmra.mrb[34].mxu1 %vm1105_vm2, %v4554_v23  ;;  %6200 = vmatprep.mubr.msk.f32.mxu0 %vm6579_vm1, %v6578_v50 }
 0xcba   :  { %6194 = vmatpush3.msra.mxu1 %v3796_v16  ;;  %6195 = vmatprep.mubr.msk.f32.mxu1 %vm6579_vm1, %v6578_v50 }
 0xcbb   :  { %6203 = vmatprep.subr.mxu1 %v6578_v50  ;;  %v4541_v25 = vpop.xlane.xlu0 %4540 }
 0xcc1   :  { %v6427_v60 = vpop.eup %6426 }
 0xcc2   :  { %v4556_v7 = vmul.f32 %v6427_v60, %v7323_v22  ;;  %v6429_v10 = vpop.eup %6428 }
 0xcc3   :  { %v4557_v52 = vmul.f32 %v6429_v10, %v7319_v41 }
 0xcc4   :  { %6196 = vmatmul.mubr.msk.f32.vlgmr.msra.gmra.mrb[36].mxu1 %vm1105_vm2, %v4556_v7 }
 0xcc5   :  { %6205 = vmatprep.mubr.msk.f32.mxu1 %vm6579_vm1, %v6578_v50 }
 0xce3   :  { %v4538_v2 = vpop.xlane.xlu1 %4537 }
 0xce4   :  { %6430 = vrcp.f32 %v4538_v2 }
 0xce5   :  { %6432 = vrcp.f32 %v4541_v25 }
 0xce7   :  { %v4544_v27 = vpop.xlane.xlu0 %4543  ;;  %v3576_v53 = vpop.permute.xlu1 %3575 }
 0xce8   :  { %6434 = vrcp.f32 %v4544_v27 }
 0xceb   :  { %v3572_v45 = vpop.permute.xlu0 %3571  ;;  %v3580_v44 = vpop.permute.xlu1 %3579 }
 0xcec   :  { %v3661_v31 = vcombine.low %v3572_v45, %v3580_v44  ;;  %v3662_v17 = vcombine.high %v3572_v45, %v3580_v44 }
 0xcee   :  { %v3669_v22 = vrot.slane %v3661_v31, %v6763_v62  ;;  %v3676_v35 = vrot.slane %v3662_v17, %v6763_v62  ;;  %v6431_v38 = vpop.eup %6430 }
 0xcef   :  { %v3584_v32 = vpop.permute.xlu1 %3583  ;;  %v6433_v18 = vpop.eup %6432  ;;  %v4558_v24 = vmul.f32 %v6431_v38, %v7337_v29 }
 0xcf0   :  { %v3677_v33 = vcombine.low %v3576_v53, %v3584_v32  ;;  %v3678_v34 = vcombine.high %v3576_v53, %v3584_v32  ;;  %v4559_v60 = vmul.f32 %v6433_v18, %v7327_v58 }
 0xcf2   :  { %v3685_v36 = vrot.slane %v3677_v33, %v6763_v62  ;;  %v3692_v59 = vrot.slane %v3678_v34, %v6763_v62  ;;  %v6435_v61 = vpop.eup %6434 }
 0xcf3   :  { %v4560_v7 = vmul.f32 %v6435_v61, %v7345_v57 }
 0xcf4   :  { %v3693_v37 = vcombine.low %v3669_v22, %v3685_v36  ;;  %v3694_v39 = vcombine.high %v3669_v22, %v3685_v36  ;;  %v3709_v54 = vcombine.low %v3676_v35, %v3692_v59  ;;  %v3710_v40 = vcombine.high %v3676_v35, %v3692_v59 }
 0xcf6   :  { %v3701_v8 = vrot.slane %v3693_v37, %v6766_v5  ;;  %v3708_v46 = vrot.slane %v3694_v39, %v6766_v5  ;;  %v3717_v43 = vrot.slane %v3709_v54, %v6766_v5  ;;  %v3724_v1 = vrot.slane %v3710_v40, %v6766_v5 }
 0xcf8   :  { %v3797_v63 = vcombine.low %v3701_v8, %v3708_v46  ;;  %v5867_v47 = vcombine.high %v3701_v8, %v3708_v46  ;;  %v3813_v3 = vcombine.low %v3717_v43, %v3724_v1  ;;  %v5868_v4 = vcombine.high %v3717_v43, %v3724_v1 }
 0xcfa   :  { %v3804_v55 = vrot.slane %v3797_v63, %v6763_v62  ;;  %v3812_v11 = vrot.slane %v5867_v47, %v6763_v62  ;;  %v3820_v56 = vrot.slane %v3813_v3, %v6763_v62  ;;  %v3828_v48 = vrot.slane %v5868_v4, %v6763_v62 }
 0xcfc   :  { %v3829_v12 = vcombine.low %v3804_v55, %v3812_v11  ;;  %v3845_v42 = vcombine.low %v3820_v56, %v3828_v48  ;;  %v3830_v13 = vcombine.high %v3804_v55, %v3812_v11  ;;  %v3846_v14 = vcombine.high %v3820_v56, %v3828_v48 }
 0xcfe   :  { %v3837_v15 = vrot.slane %v3829_v12, %v6766_v5  ;;  %v3853_v16 = vrot.slane %v3845_v42, %v6766_v5  ;;  %v3844_v19 = vrot.slane %v3830_v13, %v6766_v5  ;;  %v3860_v20 = vrot.slane %v3846_v14, %v6766_v5 }
 0xd00   :  { %v3861_v21 = vcombine.low %v3837_v15, %v3853_v16  ;;  %v3862_v0 = vcombine.high %v3837_v15, %v3853_v16  ;;  %v3863_v6 = vcombine.low %v3844_v19, %v3860_v20  ;;  %v3864_v23 = vcombine.high %v3844_v19, %v3860_v20 }
 0xd02   :  { %6199 = vmatpush3.msra.mxu0 %v3861_v21  ;;  %6204 = vmatpush3.msra.mxu1 %v3862_v0 }
 0xd03   :  { %6201 = vmatmul.mubr.msk.f32.vlgmr.msra.gmra.mrb[26].mxu0 %vm1105_vm2, %v4557_v52  ;;  %6206 = vmatmul.mubr.msk.f32.vlgmr.msra.gmra.mrb[38].mxu1 %vm1105_vm2, %v4558_v24 }
 0xd04   :  { %6208 = vmatprep.subr.mxu0 %v6578_v50  ;;  %6213 = vmatprep.subr.mxu1 %v6578_v50 }
 0xd05   :  { %6209 = vmatpush3.msra.mxu0 %v3863_v6  ;;  %6214 = vmatpush3.msra.mxu1 %v3864_v23 }
 0xd06   :  { %6210 = vmatprep.mubr.msk.f32.mxu0 %vm6579_vm1, %v6578_v50  ;;  %6215 = vmatprep.mubr.msk.f32.mxu1 %vm6579_vm1, %v6578_v50 }
 0xd07   :  { %6211 = vmatmul.mubr.msk.f32.vlgmr.msra.gmra.mrb[28].mxu0 %vm1105_vm2, %v4559_v60  ;;  %6216 = vmatmul.mubr.msk.f32.vlgmr.msra.gmra.mrb[40].mxu1 %vm1105_vm2, %v4560_v7 }
 0xd08   :  { %5666 = vmatprep.mubr.f32.mxu1 %v6578_v50 }
 0xd87   :  { %v4630_v41 = vpop.f32.mrb[22].mxu0 }
 0xd88   :  { %v6182_v29 = vpop.f32.mrb[23].mxu0 }
 0xd8b   :  { %v4776_v9 = vpop.f32.mrb[24].mxu0 }
 0xd8c   :  { %v4703_v58 = vpop.f32.mrb[34].mxu1  ;;  %v5145_v25 = vcombine.low %v4630_v41, %v4776_v9  ;;  %v5146_v57 = vcombine.high %v4630_v41, %v4776_v9  ;;  %v6192_v2 = vpop.f32.mrb[25].mxu0 }
 0xd8d   :  { %v6187_v27 = vpop.f32.mrb[35].mxu1 }
 0xd8e   :  { %v5153_v17 = vrot.slane %v5145_v25, %v6763_v62  ;;  %v5160_v32 = vrot.slane %v5146_v57, %v6763_v62 }
 0xd97   :  { %v4849_v53 = vpop.f32.mrb[36].mxu1 }
 0xd98   :  { %v5161_v45 = vcombine.low %v4703_v58, %v4849_v53  ;;  %v5162_v44 = vcombine.high %v4703_v58, %v4849_v53  ;;  %v6197_v31 = vpop.f32.mrb[37].mxu1  ;;  %v5447_v53 = vld [vmem:[#allocation5 + $0x20] sm:$0xff] }
 0xd9a   :  { %v5169_v33 = vrot.slane %v5161_v45, %v6763_v62  ;;  %v5176_v34 = vrot.slane %v5162_v44, %v6763_v62  ;;  %v5448_v45 = vld [vmem:[#allocation5 + $0x58] sm:$0xff] }
 0xd9c   :  { %v5177_v22 = vcombine.low %v5153_v17, %v5169_v33  ;;  %v5178_v35 = vcombine.high %v5153_v17, %v5169_v33  ;;  %v5193_v36 = vcombine.low %v5160_v32, %v5176_v34  ;;  %v5194_v59 = vcombine.high %v5160_v32, %v5176_v34 }
 0xd9d   :  { %v6296_v33 = vpack.c.bf16 %v5448_v45, %v5447_v53 }
 0xd9e   :  { %v5185_v37 = vrot.slane %v5177_v22, %v6766_v5  ;;  %v5192_v39 = vrot.slane %v5178_v35, %v6766_v5  ;;  %v5201_v54 = vrot.slane %v5193_v36, %v6766_v5  ;;  %v5208_v40 = vrot.slane %v5194_v59, %v6766_v5  ;;  %v5449_v59 = vld [vmem:[#allocation5 + $0x90] sm:$0xff] }
 0xd9f   :  { %6297 = vmatprep.subr.bf16.mxu0 %v6296_v33 }
 0xda0   :  { %v5281_v8 = vcombine.low %v5185_v37, %v5192_v39  ;;  %v5893_v46 = vcombine.high %v5185_v37, %v5192_v39  ;;  %v5297_v43 = vcombine.low %v5201_v54, %v5208_v40  ;;  %v5894_v1 = vcombine.high %v5201_v54, %v5208_v40  ;;  %v5450_v37 = vld [vmem:[#allocation5 + $0xc8] sm:$0xff]  ;;  %6299 = vmatpush3.bf16.msra.mxu0 %v6296_v33 }
 0xda2   :  { %v5288_v63 = vrot.slane %v5281_v8, %v6763_v62  ;;  %v5296_v47 = vrot.slane %v5893_v46, %v6763_v62  ;;  %v5304_v3 = vrot.slane %v5297_v43, %v6763_v62  ;;  %v5312_v4 = vrot.slane %v5894_v1, %v6763_v62 }
 0xda3   :  { %v6300_v46 = vpack.c.bf16 %v5450_v37, %v5449_v59  ;;  %v5580_v37 = vld [vmem:[#allocation5 + $0x98] sm:$0xff] }
 0xda4   :  { %v5313_v55 = vcombine.low %v5288_v63, %v5296_v47  ;;  %v5329_v11 = vcombine.low %v5304_v3, %v5312_v4  ;;  %v5314_v56 = vcombine.high %v5288_v63, %v5296_v47  ;;  %v5330_v48 = vcombine.high %v5304_v3, %v5312_v4 }
 0xda5   :  { %6301 = vmatprep.subr.bf16.mxu0 %v6300_v46 }
 0xda6   :  { %v7429_v10 = vrot.slane %v5313_v55, %v6766_v5  ;;  %v7432_v12 = vrot.slane %v5329_v11, %v6766_v5  ;;  %v5328_v42 = vrot.slane %v5314_v56, %v6766_v5  ;;  %v5344_v13 = vrot.slane %v5330_v48, %v6766_v5  ;;  %6303 = vmatpush3.bf16.msra.mxu0 %v6300_v46  ;;  %v5693_v46 = vld [vmem:[#allocation7 + $0x10] sm:$0xff] }
 0xda8   :  { %v5346_v14 = vcombine.high %v7429_v10, %v7432_v12  ;;  %v5345_v38 = vcombine.low %v7429_v10, %v7432_v12  ;;  %v5347_v15 = vcombine.low %v5328_v42, %v5344_v13  ;;  %v5348_v16 = vcombine.high %v5328_v42, %v5344_v13  ;;  %v7474_v12 = vld [vmem:[#allocation8] sm:$0xff] }
 0xda9   :  { %v5453_v10 = vsub.s32 7, %v6684_v26 }
 0xdaa   :  { %5419 = vrot.lane.b32.xlu0 %v5346_v14, %s6571_s17 }
 0xdae   :  { %5427 = vrot.lane.b32.xlu0 %v5347_v15, %s6583_s22 }
 0xdb2   :  { %5435 = vrot.lane.b32.xlu0 %v5348_v16, %s6584_s23 }
 0xdd6   :  { %v4922_v18 = vpop.f32.mrb[26].mxu0  ;;  %v4995_v19 = vpop.f32.mrb[38].mxu1 }
 0xdd7   :  { %v6202_v20 = vpop.f32.mrb[27].mxu0  ;;  %v6207_v21 = vpop.f32.mrb[39].mxu1 }
 0xdda   :  { %v5068_v0 = vpop.f32.mrb[28].mxu0  ;;  %v5141_v61 = vpop.f32.mrb[40].mxu1 }
 0xddb   :  { %v5213_v52 = vcombine.low %v4922_v18, %v5068_v0  ;;  %v5214_v24 = vcombine.high %v4922_v18, %v5068_v0  ;;  %v5229_v6 = vcombine.low %v4995_v19, %v5141_v61  ;;  %v5230_v23 = vcombine.high %v4995_v19, %v5141_v61  ;;  %v6212_v60 = vpop.f32.mrb[29].mxu0  ;;  %v6217_v7 = vpop.f32.mrb[41].mxu1 }
 0xddd   :  { %v5221_v41 = vrot.slane %v5213_v52, %v6763_v62  ;;  %v5228_v29 = vrot.slane %v5214_v24, %v6763_v62  ;;  %v5237_v9 = vrot.slane %v5229_v6, %v6763_v62  ;;  %v5244_v58 = vrot.slane %v5230_v23, %v6763_v62 }
 0xddf   :  { %v5245_v25 = vcombine.low %v5221_v41, %v5237_v9  ;;  %v5246_v57 = vcombine.high %v5221_v41, %v5237_v9  ;;  %v5261_v2 = vcombine.low %v5228_v29, %v5244_v58  ;;  %v5262_v27 = vcombine.high %v5228_v29, %v5244_v58 }
 0xde1   :  { %v5253_v44 = vrot.slane %v5245_v25, %v6766_v5  ;;  %v5260_v31 = vrot.slane %v5246_v57, %v6766_v5  ;;  %v5269_v17 = vrot.slane %v5261_v2, %v6766_v5  ;;  %v5276_v32 = vrot.slane %v5262_v27, %v6766_v5 }
 0xde3   :  { %v5349_v34 = vcombine.low %v5253_v44, %v5260_v31  ;;  %v5895_v22 = vcombine.high %v5253_v44, %v5260_v31  ;;  %v5365_v35 = vcombine.low %v5269_v17, %v5276_v32  ;;  %v5896_v36 = vcombine.high %v5269_v17, %v5276_v32  ;;  %v5577_v31 = vld [vmem:[#allocation5 + $0x30] sm:$0xff]  ;;  %v5579_v17 = vld [vmem:[#allocation5 + $0x68] sm:$0xff] }
 0xde4   :  { %v5576_v32 = vld [vmem:[#allocation5 + $0x28] sm:$0xff]  ;;  %v6304_v33 = vpack.c.bf16 %v5579_v17, %v5577_v31 }
 0xde5   :  { %v5356_v39 = vrot.slane %v5349_v34, %v6763_v62  ;;  %v5364_v54 = vrot.slane %v5895_v22, %v6763_v62  ;;  %v5372_v40 = vrot.slane %v5365_v35, %v6763_v62  ;;  %v5380_v8 = vrot.slane %v5896_v36, %v6763_v62  ;;  %v5578_v34 = vld [vmem:[#allocation5 + $0x60] sm:$0xff]  ;;  %v5583_v35 = vld [vmem:[#allocation5 + $0xd8] sm:$0xff] }
 0xde6   :  { %v5581_v22 = vld [vmem:[#allocation5 + $0xa0] sm:$0xff]  ;;  %v6306_v36 = vpack.c.bf16 %v5578_v34, %v5576_v32  ;;  %6305 = vmatprep.subr.bf16.mxu1 %v6304_v33 }
 0xde7   :  { %v5381_v43 = vcombine.low %v5356_v39, %v5364_v54  ;;  %v5382_v1 = vcombine.high %v5356_v39, %v5364_v54  ;;  %v5397_v63 = vcombine.low %v5372_v40, %v5380_v8  ;;  %v5398_v47 = vcombine.high %v5372_v40, %v5380_v8  ;;  %v5582_v39 = vld [vmem:[#allocation5 + $0xd0] sm:$0xff]  ;;  %v5691_v40 = vld [vmem:[#allocation7] sm:$0xff]  ;;  %v5692_v8 = vld [vmem:[#allocation7 + $0x8] sm:$0xff] }
 0xde8   :  { %v6308_v59 = vpack.c.bf16 %v5583_v35, %v5581_v22  ;;  %6307 = vmatpush1.bf16.msra.mxu1 %v6306_v36  ;;  %v6310_v54 = vpack.c.bf16 %v5582_v39, %v5580_v37 }
 0xde9   :  { %v5389_v3 = vrot.slane %v5381_v43, %v6766_v5  ;;  %v5405_v4 = vrot.slane %v5397_v63, %v6766_v5  ;;  %v5396_v55 = vrot.slane %v5382_v1, %v6766_v5  ;;  %v5412_v11 = vrot.slane %v5398_v47, %v6766_v5  ;;  %v5694_v1 = vld [vmem:[#allocation7 + $0x18] sm:$0xff] }
 0xdea   :  { %6309 = vmatprep.subr.bf16.mxu1 %v6308_v59  ;;  %v6312_v43 = vpack.c.bf16 %v5692_v8, %v5691_v40  ;;  %v6316_v63 = vpack.c.bf16 %v5694_v1, %v5693_v46 }
 0xdeb   :  { %v5414_v56 = vcombine.high %v5389_v3, %v5405_v4  ;;  %v5413_v48 = vcombine.low %v5389_v3, %v5405_v4  ;;  %v5415_v42 = vcombine.low %v5396_v55, %v5412_v11  ;;  %v5416_v62 = vcombine.high %v5396_v55, %v5412_v11 }
 0xdec   :  { %6311 = vmatpush1.bf16.msra.mxu1 %v6310_v54  ;;  %6313 = vmatprep.subr.bf16.mxu0 %v6312_v43 }
 0xded   :  { %5421 = vrot.lane.b32.xlu1 %v5414_v56, %s6571_s17 }
 0xdf1   :  { %5429 = vrot.lane.b32.xlu1 %v5415_v42, %s6583_s22  ;;  %v5572_v42 = vsub.s32 5, %v6684_v26 }
 0xdf5   :  { %5437 = vrot.lane.b32.xlu1 %v5416_v62, %s6584_s23 }
 0xe1c   :  { %v5420_v13 = vpop.permute.xlu0 %5419 }
 0xe1d   :  { %v5441_v15 = vsel %vm1105_vm2, %v5345_v38, %v5420_v13  ;;  %v5454_v38 = vrot.slane %v7474_v12, %v5453_v10  ;;  %v5697_v10 = vld [vmem:[#allocation7 + $0x30] sm:$0xff] }
 0xe20   :  { %v5428_v14 = vpop.permute.xlu0 %5427 }
 0xe21   :  { %v5443_v5 = vsel %vm2684_vm3, %v5441_v15, %v5428_v14  ;;  %v5573_v15 = vrot.slane %v7474_v12, %v5572_v42 }
 0xe24   :  { %v5436_v16 = vpop.permute.xlu0 %5435 }
 0xe25   :  { %v5445_v18 = vsel %vm2687_vm4, %v5443_v5, %v5436_v16 }
 0xe26   :  { %6226 = vmatprep.mubr.msk.f32.mxu0 %vm80_vm0, %v5445_v18 }
 0xe5f   :  { %v5422_v19 = vpop.permute.xlu1 %5421 }
 0xe60   :  { %v5442_v21 = vsel %vm1105_vm2, %v5413_v48, %v5422_v19  ;;  %v5566_v48 = vsub.s32 4, %v6684_v26 }
 0xe62   :  { %v5567_v62 = vrot.slane %v7474_v12, %v5566_v48 }
 0xe63   :  { %v5430_v20 = vpop.permute.xlu1 %5429 }
 0xe64   :  { %v5444_v0 = vsel %vm2684_vm3, %v5442_v21, %v5430_v20 }
 0xe67   :  { %v5438_v61 = vpop.permute.xlu1 %5437 }
 0xe68   :  { %v5446_v52 = vsel %vm2687_vm4, %v5444_v0, %v5438_v61  ;;  %v5695_v0 = vld [vmem:[#allocation7 + $0x20] sm:$0xff]  ;;  %v5696_v61 = vld [vmem:[#allocation7 + $0x28] sm:$0xff] }
 0xe69   :  { %6227 = vmatmul.mubr.msk.f32.vlgmr.msra.gmra.mrb[30].mxu0 %vm80_vm0, %v5446_v52  ;;  %v6320_v52 = vpack.c.bf16 %v5696_v61, %v5695_v0 }
 0xe6a   :  { %6315 = vmatpush3.bf16.msra.mxu0 %v6312_v43 }
 0xe6b   :  { %6317 = vmatprep.subr.bf16.mxu0 %v6316_v63 }
 0xe6e   :  { %6319 = vmatpush3.bf16.msra.mxu0 %v6316_v63  ;;  %v5901_v63 = vld [vmem:[#allocation8 + $0x8] ss:$0 sm:$0xff] }
 0xe6f   :  { %6321 = vmatprep.subr.bf16.mxu0 %v6320_v52 }
 0xe72   :  { %6323 = vmatpush3.bf16.msra.mxu0 %v6320_v52 }
 0xf3c   :  { %v6228_v24 = vpop.f32.mrb[30].mxu0 }
 0xf3d   :  { %v5533_v6 = vadd.f32 %v6228_v24, %v5454_v38  ;;  %v5527_v23 = vpop.f32.mrb[31].mxu0  ;;  %v5699_v24 = vld [vmem:[#allocation7 + $0x40] sm:$0xff] }
 0xf3e   :  { %v5528_v60 = vadd.f32 %v5527_v23, %v5454_v38  ;;  %v5698_v38 = vld [vmem:[#allocation7 + $0x38] sm:$0xff] }
 0xf3f   :  { %v7478_v7 = vadd.f32 %v5533_v6, %v7080_v51  ;;  %v6324_v12 = vpack.c.bf16 %v5698_v38, %v5697_v10  ;;  %v5700_v6 = vld [vmem:[#allocation7 + $0x48] sm:$0xff] }
 0xf40   :  { %v7481_v41 = vadd.f32 %v5528_v60, %v7082_v49  ;;  %v6328_v23 = vpack.c.bf16 %v5700_v6, %v5699_v24  ;;  %v5701_v60 = vld [vmem:[#allocation7 + $0x50] sm:$0xff] }
 0xf41   :  { %v5541_v29 = vsel %vm80_vm0, %v7478_v7, 0.0  ;;  %6325 = vmatprep.subr.bf16.mxu0 %v6324_v12 }
 0xf42   :  { %5542 = vadd.xlane.f32.xlu1 %v5541_v29  ;;  %v5538_v9 = vsel %vm80_vm0, %v7481_v41, 0.0  ;;  %6327 = vmatpush3.bf16.msra.mxu0 %v6324_v12 }
 0xf43   :  { %5539 = vadd.xlane.f32.xlu0 %v5538_v9  ;;  %6329 = vmatprep.subr.bf16.mxu0 %v6328_v23  ;;  %v5703_v9 = vld [vmem:[#allocation7 + $0x60] sm:$0xff] }
 0xf46   :  { %6331 = vmatpush3.bf16.msra.mxu0 %v6328_v23 }
 0xfcf   :  { %v5543_v58 = vpop.xlane.xlu1 %5542 }
 0xfd0   :  { %v5545_v25 = vmul.f32 0.03125, %v5543_v58  ;;  %v5540_v57 = vpop.xlane.xlu0 %5539  ;;  %v5704_v58 = vld [vmem:[#allocation7 + $0x68] sm:$0xff] }
 0xfd1   :  { %v5544_v2 = vmul.f32 0.03125, %v5540_v57  ;;  %v5705_v57 = vld [vmem:[#allocation7 + $0x70] sm:$0xff] }
 0xfd2   :  { %v5547_v27 = vsub.f32 %v7478_v7, %v5545_v25  ;;  %v6336_v25 = vpack.c.bf16 %v5704_v58, %v5703_v9 }
 0xfd3   :  { %v5546_v51 = vsub.f32 %v7481_v41, %v5544_v2  ;;  %v5706_v2 = vld [vmem:[#allocation7 + $0x78] sm:$0xff] }
 0xfd4   :  { %v5549_v45 = vmul.f32 %v5547_v27, %v5547_v27 }
 0xfd5   :  { %v5548_v53 = vmul.f32 %v5546_v51, %v5546_v51 }
 0xfd6   :  { %v5553_v44 = vsel %vm80_vm0, %v5549_v45, 0.0 }
 0xfd7   :  { %v5550_v49 = vsel %vm80_vm0, %v5548_v53, 0.0 }
 0xfd8   :  { %5551 = vadd.xlane.f32.xlu0 %v5550_v49 }
 0xfdc   :  { %5554 = vadd.xlane.f32.xlu0 %v5553_v44 }
0x1065   :  { %v5552_v47 = vpop.xlane.xlu0 %5551 }
0x1066   :  { %v5556_v3 = vmul.f32 0.03125, %v5552_v47 }
0x1068   :  { %v5558_v4 = vadd.f32 1e-05, %v5556_v3 }
0x1069   :  { %v5555_v55 = vpop.xlane.xlu0 %5554 }
0x106a   :  { %6436 = vrsqrt.f32 %v5558_v4  ;;  %v5557_v11 = vmul.f32 0.03125, %v5555_v55 }
0x106c   :  { %v5559_v56 = vadd.f32 1e-05, %v5557_v11 }
0x106e   :  { %6438 = vrsqrt.f32 %v5559_v56 }
0x1074   :  { %v6437_v13 = vpop.eup %6436 }
0x1075   :  { %v5562_v14 = vmul.f32 %v6437_v13, %v5546_v51  ;;  %v5584_v51 = vld [vmem:[%s7528_s4] sm:$0x3]  ;;  %s6585_s4 = smov [#allocation10]  }
0x1076   :  { %v5593_v53 = vrot.slane %v5584_v51, %v116_v30  ;;  %v5589_v22 = vrot.slane %v5584_v51, %v110_v28  ;;  %s5795_s26 = sshll.u32 %s6585_s4, 4  ;;  %s5796_s26 = int_to_ptr.vmem [resolvable:$true] %s5795_s26 }
0x1077   :  { %v5568_v5 = vmul.f32 %v5567_v62, %v5562_v14  ;;  %s6536_s27 = scalar_lea.vmem %s5796_s26, 256  ;;  %p6541_p5 = scmp.lt.s32.totalorder %s5796_s26, %s5796_s26 }
0x1078   :  { %v6439_v16 = vpop.eup %6438  ;;  %p6537_p4 = scmp.ne.s32.totalorder %s5796_s26, %s6536_s27  ;;  %p6542_p6 = scmp.lt.s32.totalorder %s6536_s27, %s6536_s27 }
0x1079   :  { %v5574_v18 = vadd.f32 %v5573_v15, %v5568_v5  ;;  %v5563_v19 = vmul.f32 %v6439_v16, %v5547_v27  ;;  %v6340_v27 = vpack.c.bf16 %v5706_v2, %v5705_v57 }
0x107a   :  { %p6543_p7 = por %p6542_p6, %p6541_p5 }
0x107b   :  { %5899 = vmatmul.mubr.msk.f32.vlgmr.msra.gmra.mrb[42].mxu1 %vm80_vm0, %v5574_v18  ;;  %v5569_v20 = vmul.f32 %v5567_v62, %v5563_v19 }
0x107c   :  { %5672 = vmatprep.mubr.f32.mxu1 %v6578_v50  ;;  %v5702_v50 = vld [vmem:[#allocation7 + $0x58] sm:$0xff]  ;;  %p6544_p8 = pnand %p6543_p7, %p6537_p4 }
0x107d   :  { %v5575_v21 = vadd.f32 %v5573_v15, %v5569_v20  ;;  %v6332_v29 = vpack.c.bf16 %v5702_v50, %v5701_v60 }
0x107f   :  { %5900 = vmatmul.mubr.msk.f32.gmra.mrb[44].mxu1 %vm80_vm0, %v5575_v21  ;;  %6333 = vmatprep.subr.bf16.mxu0 %v6332_v29 }
0x1080   :  { %6335 = vmatpush3.bf16.msra.mxu0 %v6332_v29 }
0x1081   :  { %6337 = vmatprep.subr.bf16.mxu0 %v6336_v25 }
0x1084   :  { %6339 = vmatpush3.bf16.msra.mxu0 %v6336_v25 }
0x1085   :  { %6341 = vmatprep.subr.bf16.mxu0 %v6340_v27 }
0x1088   :  { %6343 = vmatpush3.bf16.msra.mxu0 %v6340_v27 }
0x114e   :  { %v5668_v49 = vpop.f32.mrb[42].mxu1 }
0x114f   :  { %v5670_v45 = vpop.f32.mrb[43].mxu1  ;;  %v5669_v37 = vadd.f32 %v5668_v49, %v5589_v22 }
0x1150   :  { %v5671_v44 = vadd.f32 %v5670_v45, %v5593_v53 }
0x1152   :  { %v5681_v31 = vmul.f32 0.70710677, %v5671_v44  ;;  %v5674_v17 = vpop.f32.mrb[44].mxu1  ;;  %v5679_v36 = vmul.f32 0.5, %v5671_v44 }
0x1153   :  { %v5676_v32 = vpop.f32.mrb[45].mxu1  ;;  %v5675_v46 = vadd.f32 %v5674_v17, %v5589_v22 }
0x1154   :  { %6440 = verf.f32 %v5681_v31  ;;  %v5677_v33 = vadd.f32 %v5676_v32, %v5593_v53 }
0x1156   :  { %v5682_v34 = vmul.f32 0.70710677, %v5677_v33  ;;  %v5680_v30 = vmul.f32 0.5, %v5677_v33 }
0x1158   :  { %6442 = verf.f32 %v5682_v34 }
0x115e   :  { %v6441_v35 = vpop.eup %6440 }
0x115f   :  { %v5685_v59 = vadd.f32 1.0, %v6441_v35 }
0x1161   :  { %v5687_v39 = vmul.f32 %v5685_v59, %v5679_v36 }
0x1162   :  { %v6443_v54 = vpop.eup %6442 }
0x1163   :  { %v5686_v40 = vadd.f32 1.0, %v6443_v54  ;;  %v5689_v8 = vmul.f32 %v5687_v39, %v5669_v37 }
0x1165   :  { %v5688_v43 = vmul.f32 %v5686_v40, %v5680_v30  ;;  %6261 = vmatprep.mubr.f32.mxu0 %v5689_v8 }
0x1167   :  { %v5690_v1 = vmul.f32 %v5688_v43, %v5675_v46 }
0x1169   :  { %6262 = vmatmul.mubr.f32.vlgmr.msra.gmra.mrb[32].mxu0 %v5690_v1 }
0x123c   :  { %v6263_v47 = vpop.f32.mrb[32].mxu0 }
0x123d   :  { %v5783_v3 = vadd.f32 %v6263_v47, %v5901_v63  ;;  %v5777_v4 = vpop.f32.mrb[33].mxu0 }
0x123e   :  { %v5778_v26 = vadd.f32 %v5901_v63, %v5777_v4 }
0x123f   :  { %v5787_v28 = vadd.f32 %v5783_v3, %v7478_v7 }
0x1240   :  { %v5786_v55 = vadd.f32 %v5778_v26, %v7481_v41 }
0x1241   :  { %5789 = vst.msk [vmem:[#allocation10 + $0x8] sm:$0xff] %vm80_vm0, %v5787_v28 }
0x1242   :  { %5788 = vst.msk [vmem:[#allocation10] sm:$0xff] %vm80_vm0, %v5786_v55 }
0x1243   :  { %6547 = shalt.err (!%p6544_p8)
}
0x1244   :  { %s6548_s30 = scalar_lea.hbm %s7529_s5, 256 }
0x1245   :  { %p6549_p9 = scmp.ne.s32.totalorder %s7529_s5, %s6548_s30  ;;  %p6552_p10 = scmp.lt.u32.totalorder %s6548_s30, %s7529_s5 }
0x1247   :  { %p6554_p11 = pnand %p6552_p10, %p6549_p9 }
0x1249   :  { %6557 = shalt.err (!%p6554_p11)
}
0x124a   :  { %5801 = dma.vmem_to_hbm [thread:$0]  %s5796_s26, 256, %s7529_s5, [#allocation4], %s6570_s1, %s6570_s1, %s6571_s17  }
0x124b   :  { %6564 = dma.done.wait [#allocation4], 256  }
0x124c   :  { %6565 = vsyncadd [#allocation4], 4294967040 }
0x124d   :  { %5805 = vsyncpa [#allocation3], 1 }
0x124e   :  { %5806 = vsyncpa [#allocation6], 1 }
0x124f   :  { %5807 = vsyncpa [#allocation9], 1 }
0x1250   :  { %5808 = vsyncpa [#allocation4], 1 }

</bundles_post_ra>
